<compile_context>
chip_gen: v7x
topology: tpu7x:2x2x1
jax: 0.10.0
libtpu: 0.0.40
codegen_flags: <defaults>
</compile_context>

<pallas_src>
import functools
import math

import numpy as np
import jax
import jax.numpy as jnp
from jax.experimental import pallas as pl
from jax.experimental.pallas import tpu as pltpu


# ---------------------------------------------------------------------------
# Tiling helpers.
# ---------------------------------------------------------------------------
_ROW_TILES = (512, 256, 128, 64, 32, 16, 8)    # sublane-axis candidates (mult of 8)
_LANE_TILES = (512, 256, 128)                  # lane-axis candidates (mult of 128)


def _pick_tile(dim, candidates):
    """Largest candidate that evenly divides `dim`, else the full dim (always legal)."""
    for c in candidates:
        if dim % c == 0:
            return c
    return dim


def _mosaic(dimension_semantics, vmem_estimate_bytes=0):
    kwargs = dict(dimension_semantics=dimension_semantics)
    # Only raise the scoped-VMEM limit when the estimate exceeds the smallest
    # default (v5e 16 MiB / v6e,v7x 32 MiB); cap under v7x's 64 MiB physical VMEM.
    if vmem_estimate_bytes > 28 * 1024 * 1024:
        kwargs["vmem_limit_bytes"] = int(min(vmem_estimate_bytes * 1.5, 60 * 1024 * 1024))
    return pltpu.CompilerParams(**kwargs)


# ---------------------------------------------------------------------------
# Kernel 1: tiled matmul + bias (+ optional ReLU) with f32 VMEM accumulator.
# ---------------------------------------------------------------------------
def _matmul_bias_kernel(x_ref, w_ref, b_ref, o_ref, acc_ref, *, activation):
    @pl.when(pl.program_id(2) == 0)
    def _init():
        acc_ref[...] = jnp.zeros_like(acc_ref)

    acc_ref[...] += jnp.dot(x_ref[...], w_ref[...],
                            preferred_element_type=jnp.float32)

    @pl.when(pl.program_id(2) == pl.num_programs(2) - 1)
    def _store():
        acc = acc_ref[...] + b_ref[...].astype(jnp.float32)
        if activation == "relu":
            acc = jnp.maximum(acc, 0.0)
        o_ref[...] = acc.astype(o_ref.dtype)


def linear(x, w, b, activation=None):
    M, K = x.shape
    N = w.shape[1]
    tm = _pick_tile(M, _ROW_TILES)
    tn = _pick_tile(N, _LANE_TILES)
    tk = _pick_tile(K, _LANE_TILES)
    grid = (M // tm, N // tn, K // tk)
    vmem_est = 4 * (2 * (tm * tk + tk * tn + tn) + 2 * tm * tn + tm * tn)
    cost = pl.CostEstimate(flops=2 * M * K * N, transcendentals=0,
                           bytes_accessed=4 * (M * K + K * N + M * N + N))
    return pl.pallas_call(
        functools.partial(_matmul_bias_kernel, activation=activation),
        out_shape=jax.ShapeDtypeStruct((M, N), x.dtype),
        grid=grid,
        in_specs=[
            pl.BlockSpec((tm, tk), lambda i, j, k: (i, k)),
            pl.BlockSpec((tk, tn), lambda i, j, k: (k, j)),
            pl.BlockSpec((1, tn), lambda i, j, k: (0, j)),
        ],
        out_specs=pl.BlockSpec((tm, tn), lambda i, j, k: (i, j)),
        scratch_shapes=[pltpu.VMEM((tm, tn), jnp.float32)],
        compiler_params=_mosaic(("parallel", "parallel", "arbitrary"), vmem_est),
        cost_estimate=cost,
    )(x, w, b.reshape(1, N))


# ---------------------------------------------------------------------------
# Kernel 2: fused (x @ W + b) + residual + LayerNorm  (attention out-projection).
# Tiled over rows; the weight/bias/gamma/beta blocks stay resident in VMEM.
# ---------------------------------------------------------------------------
def _linear_add_ln_kernel(x_ref, w_ref, b_ref, r_ref, g_ref, beta_ref, o_ref, *, eps):
    acc = jnp.dot(x_ref[...], w_ref[...], preferred_element_type=jnp.float32)
    z = acc + b_ref[...].astype(jnp.float32) + r_ref[...].astype(jnp.float32)
    mean = jnp.mean(z, axis=-1, keepdims=True)
    var = jnp.mean(jnp.square(z - mean), axis=-1, keepdims=True)
    n = (z - mean) * jax.lax.rsqrt(var + eps)
    o_ref[...] = (n * g_ref[...] + beta_ref[...]).astype(o_ref.dtype)


def linear_add_layernorm(x, w, b, residual, gamma, beta, eps):
    M, K = x.shape
    N = w.shape[1]
    tm = _pick_tile(M, _ROW_TILES)
    grid = (M // tm,)
    vmem_est = 4 * (2 * (tm * K + tm * N + tm * N) + K * N + 3 * N)
    cost = pl.CostEstimate(flops=2 * M * K * N + 10 * M * N, transcendentals=M,
                           bytes_accessed=4 * (M * K + K * N + 2 * M * N + 3 * N))
    return pl.pallas_call(
        functools.partial(_linear_add_ln_kernel, eps=eps),
        out_shape=jax.ShapeDtypeStruct((M, N), x.dtype),
        grid=grid,
        in_specs=[
            pl.BlockSpec((tm, K), lambda i: (i, 0)),
            pl.BlockSpec((K, N), lambda i: (0, 0)),
            pl.BlockSpec((1, N), lambda i: (0, 0)),
            pl.BlockSpec((tm, N), lambda i: (i, 0)),
            pl.BlockSpec((1, N), lambda i: (0, 0)),
            pl.BlockSpec((1, N), lambda i: (0, 0)),
        ],
        out_specs=pl.BlockSpec((tm, N), lambda i: (i, 0)),
        compiler_params=_mosaic(("parallel",), vmem_est),
        cost_estimate=cost,
    )(x, w, b.reshape(1, N), residual, gamma.reshape(1, N), beta.reshape(1, N))


# ---------------------------------------------------------------------------
# Kernel 3: fused FFN (W1 -> ReLU -> W2) + residual + LayerNorm.
# Hidden activation lives entirely in VMEM (no HBM round-trip).
# ---------------------------------------------------------------------------
def _ffn_add_ln_kernel(x_ref, w1_ref, b1_ref, w2_ref, b2_ref, g_ref, beta_ref,
                       o_ref, *, eps):
    x32 = x_ref[...].astype(jnp.float32)
    h = jnp.dot(x_ref[...], w1_ref[...], preferred_element_type=jnp.float32)
    h = jnp.maximum(h + b1_ref[...].astype(jnp.float32), 0.0)
    f = jnp.dot(h.astype(x_ref.dtype), w2_ref[...], preferred_element_type=jnp.float32)
    z = f + b2_ref[...].astype(jnp.float32) + x32
    mean = jnp.mean(z, axis=-1, keepdims=True)
    var = jnp.mean(jnp.square(z - mean), axis=-1, keepdims=True)
    n = (z - mean) * jax.lax.rsqrt(var + eps)
    o_ref[...] = (n * g_ref[...] + beta_ref[...]).astype(o_ref.dtype)


def ffn_add_layernorm(x, w1, b1, w2, b2, gamma, beta, eps):
    M, D = x.shape
    H = w1.shape[1]
    tm = _pick_tile(M, _ROW_TILES)
    grid = (M // tm,)
    vmem_est = 4 * (2 * (tm * D + tm * D) + D * H + H * D + tm * H + H + 3 * D)
    cost = pl.CostEstimate(flops=4 * M * D * H + 12 * M * D, transcendentals=M,
                           bytes_accessed=4 * (2 * M * D + 2 * D * H + H + 3 * D))
    return pl.pallas_call(
        functools.partial(_ffn_add_ln_kernel, eps=eps),
        out_shape=jax.ShapeDtypeStruct((M, D), x.dtype),
        grid=grid,
        in_specs=[
            pl.BlockSpec((tm, D), lambda i: (i, 0)),
            pl.BlockSpec((D, H), lambda i: (0, 0)),
            pl.BlockSpec((1, H), lambda i: (0, 0)),
            pl.BlockSpec((H, D), lambda i: (0, 0)),
            pl.BlockSpec((1, D), lambda i: (0, 0)),
            pl.BlockSpec((1, D), lambda i: (0, 0)),
            pl.BlockSpec((1, D), lambda i: (0, 0)),
        ],
        out_specs=pl.BlockSpec((tm, D), lambda i: (i, 0)),
        compiler_params=_mosaic(("parallel",), vmem_est),
        cost_estimate=cost,
    )(x, w1, b1.reshape(1, H), w2, b2.reshape(1, D),
      gamma.reshape(1, D), beta.reshape(1, D))


# ---------------------------------------------------------------------------
# Kernel 4: scaled-dot-product attention; grid over batch, all heads per step.
# Q/K/V stay in (B, S, H*d) layout — no host-side head transposes.
# ---------------------------------------------------------------------------
def _attention_kernel(q_ref, k_ref, v_ref, o_ref, *, n_heads, dk, dv, scale):
    q = q_ref[0].astype(jnp.float32) * scale          # fold 1/sqrt(dk) into Q
    k = k_ref[0].astype(jnp.float32)
    v = v_ref[0].astype(jnp.float32)
    outs = []
    for h in range(n_heads):                           # static unroll over heads
        qh = q[:, h * dk:(h + 1) * dk]
        kh = k[:, h * dk:(h + 1) * dk]
        vh = v[:, h * dv:(h + 1) * dv]
        s = jax.lax.dot_general(qh, kh, (((1,), (1,)), ((), ())),
                                preferred_element_type=jnp.float32)   # (Sq, Skv)
        m = jnp.max(s, axis=-1, keepdims=True)
        p = jnp.exp(s - m)
        p = p * pl.reciprocal(jnp.sum(p, axis=-1, keepdims=True), approx=True)
        outs.append(jnp.dot(p, vh, preferred_element_type=jnp.float32))
    # Lane-dense store of all heads at once.
    o_ref[0] = jnp.concatenate(outs, axis=-1).astype(o_ref.dtype)


def attention(q, k, v, n_heads, dk, dv, scale):
    B, Sq, Hdk = q.shape
    Skv = k.shape[1]
    Hdv = v.shape[2]
    cost = pl.CostEstimate(
        flops=2 * B * Sq * Skv * (Hdk + Hdv),
        transcendentals=B * n_heads * Sq * Skv,
        bytes_accessed=4 * (B * Sq * Hdk + B * Skv * Hdk + B * Skv * Hdv + B * Sq * Hdv))
    return pl.pallas_call(
        functools.partial(_attention_kernel, n_heads=n_heads, dk=dk, dv=dv, scale=scale),
        out_shape=jax.ShapeDtypeStruct((B, Sq, Hdv), q.dtype),
        grid=(B,),
        in_specs=[
            pl.BlockSpec((1, Sq, Hdk), lambda b: (b, 0, 0)),
            pl.BlockSpec((1, Skv, Hdk), lambda b: (b, 0, 0)),
            pl.BlockSpec((1, Skv, Hdv), lambda b: (b, 0, 0)),
        ],
        out_specs=pl.BlockSpec((1, Sq, Hdv), lambda b: (b, 0, 0)),
        compiler_params=_mosaic(("parallel",)),
        cost_estimate=cost,
    )(q, k, v)


# ---------------------------------------------------------------------------
# Kernel 5: fused embedding + positional-encoding add (+ optional scale) + LayerNorm.
# ---------------------------------------------------------------------------
def _embed_ln_kernel(e_ref, p_ref, g_ref, b_ref, o_ref, *, eps, scale):
    z = e_ref[0].astype(jnp.float32) + p_ref[...].astype(jnp.float32)
    if scale != 1.0:
        z = z * scale
    mean = jnp.mean(z, axis=-1, keepdims=True)
    var = jnp.mean(jnp.square(z - mean), axis=-1, keepdims=True)
    n = (z - mean) * jax.lax.rsqrt(var + eps)
    o_ref[0] = (n * g_ref[...] + b_ref[...]).astype(o_ref.dtype)


def embed_posenc_layernorm(emb, pe, gamma, beta, eps, scale):
    B, S, D = emb.shape
    return pl.pallas_call(
        functools.partial(_embed_ln_kernel, eps=eps, scale=scale),
        out_shape=jax.ShapeDtypeStruct((B, S, D), emb.dtype),
        grid=(B,),
        in_specs=[
            pl.BlockSpec((1, S, D), lambda b: (b, 0, 0)),
            pl.BlockSpec((S, D), lambda b: (0, 0)),
            pl.BlockSpec((1, D), lambda b: (0, 0)),
            pl.BlockSpec((1, D), lambda b: (0, 0)),
        ],
        out_specs=pl.BlockSpec((1, S, D), lambda b: (b, 0, 0)),
        compiler_params=_mosaic(("parallel",)),
    )(emb, pe, gamma.reshape(1, D), beta.reshape(1, D))


# ---------------------------------------------------------------------------
# Multi-head attention wrappers (fused QKV / KV projections, packed heads).
# ---------------------------------------------------------------------------
def mha_self(x, p, n_heads, dk, dv):
    B, S, D = x.shape
    Hdk, Hdv = n_heads * dk, n_heads * dv
    qkv = linear(x.reshape(B * S, D), p["w_qkv"], p["b_qkv"])        # (B*S, 2*Hdk+Hdv)
    q = qkv[:, :Hdk].reshape(B, S, Hdk)
    k = qkv[:, Hdk:2 * Hdk].reshape(B, S, Hdk)
    v = qkv[:, 2 * Hdk:].reshape(B, S, Hdv)
    return attention(q, k, v, n_heads, dk, dv, 1.0 / math.sqrt(dk))  # (B, S, Hdv)


def mha_cross(x_q, x_kv, p, n_heads, dk, dv):
    B, Sq, D = x_q.shape
    Skv = x_kv.shape[1]
    Hdk, Hdv = n_heads * dk, n_heads * dv
    q = linear(x_q.reshape(B * Sq, D), p["wq"], p["bq"]).reshape(B, Sq, Hdk)
    kv = linear(x_kv.reshape(B * Skv, D), p["w_kv"], p["b_kv"])      # (B*Skv, Hdk+Hdv)
    k = kv[:, :Hdk].reshape(B, Skv, Hdk)
    v = kv[:, Hdk:].reshape(B, Skv, Hdv)
    return attention(q, k, v, n_heads, dk, dv, 1.0 / math.sqrt(dk))  # (B, Sq, Hdv)


# ---------------------------------------------------------------------------
# Decoder layer: self-attn -> add&LN -> cross-attn -> add&LN -> FFN -> add&LN.
# (add&LN is fused into the preceding matmul kernel in every case.)
# ---------------------------------------------------------------------------
def decoder_layer(dec_out, enc_out, p, n_heads, dk, dv, eps=1e-6):
    B, S, D = dec_out.shape
    Hdv = n_heads * dv
    x = dec_out.reshape(B * S, D)

    sa = mha_self(dec_out, p["self_attn"], n_heads, dk, dv)
    x = linear_add_layernorm(sa.reshape(B * S, Hdv), p["self_attn"]["wo"],
                             p["self_attn"]["bo"], x, p["ln1_g"], p["ln1_b"], eps)

    ca = mha_cross(x.reshape(B, S, D), enc_out, p["cross_attn"], n_heads, dk, dv)
    x = linear_add_layernorm(ca.reshape(B * S, Hdv), p["cross_attn"]["wo"],
                             p["cross_attn"]["bo"], x, p["ln2_g"], p["ln2_b"], eps)

    x = ffn_add_layernorm(x, p["ffn_w1"], p["ffn_b1"], p["ffn_w2"], p["ffn_b2"],
                          p["ln3_g"], p["ln3_b"], eps)
    return x.reshape(B, S, D)


# ---------------------------------------------------------------------------
# Sinusoidal positional encoding (what the buggy torch pos_enc intends).
# ---------------------------------------------------------------------------
def sinusoidal_pos_enc(dim, positions):
    pos = np.arange(positions, dtype=np.float64)[:, None]
    i = np.arange(dim)[None, :]
    angles = pos / np.power(10000.0, (2.0 * (i // 2)) / dim)
    angles[:, 0::2] = np.sin(angles[:, 0::2])
    angles[:, 1::2] = np.cos(angles[:, 1::2])
    return jnp.asarray(angles, dtype=jnp.float32)            # (positions, dim)


# ---------------------------------------------------------------------------
# Full Decoder forward.
# ---------------------------------------------------------------------------
def decoder_forward(params, dec_input, enc_output, *, n_heads, dk, dv, scale_emb=False):
    B, S = dec_input.shape
    D = params["embd"].shape[1]

    # TODO(synk): embedding gather stays as XLA indexing glue (no efficient Pallas
    # gather at this scale); dropout is identity at inference; no attention masks
    # in this run (reference forward defaults both masks to None).
    emb = params["embd"][dec_input]                          # (B, S, D)
    pe = params["pos_enc"][:S]                               # (S, D)

    s = (D ** 0.5) if scale_emb else 1.0                     # applied to (emb + pe), as in reference
    x = embed_posenc_layernorm(emb, pe, params["ln_g"], params["ln_b"], 1e-9, s)

    for lp in params["layers"]:
        x = decoder_layer(x, enc_output, lp, n_heads, dk, dv)
    return x


# ---------------------------------------------------------------------------
# Deterministic parameter initialization (QKV / KV weights stored pre-fused).
# ---------------------------------------------------------------------------
def init_params(key, src_vocab, embd_dim, pad_idx, n_heads, n_layers, dk, dv,
                hidden_dim, seq_len):
    ks = iter(jax.random.split(key, 8 + n_layers * 16))

    def w(shape, scale=0.02):
        return jax.random.normal(next(ks), shape, jnp.float32) * scale

    embd = jax.random.normal(next(ks), (src_vocab, embd_dim), jnp.float32)
    embd = embd.at[pad_idx].set(0.0)  # padding_idx row is zero

    params = {
        "embd": embd,
        "pos_enc": sinusoidal_pos_enc(embd_dim, seq_len),
        "ln_g": jnp.ones((embd_dim,), jnp.float32),
        "ln_b": jnp.zeros((embd_dim,), jnp.float32),
        "layers": [],
    }

    Hdk, Hdv = n_heads * dk, n_heads * dv

    def self_attn_params():
        return {
            "w_qkv": w((embd_dim, 2 * Hdk + Hdv)),                    # fused Q|K|V
            "b_qkv": jnp.zeros((2 * Hdk + Hdv,), jnp.float32),
            "wo": w((Hdv, embd_dim)), "bo": jnp.zeros((embd_dim,), jnp.float32),
        }

    def cross_attn_params():
        return {
            "wq": w((embd_dim, Hdk)), "bq": jnp.zeros((Hdk,), jnp.float32),
            "w_kv": w((embd_dim, Hdk + Hdv)),                         # fused K|V
            "b_kv": jnp.zeros((Hdk + Hdv,), jnp.float32),
            "wo": w((Hdv, embd_dim)), "bo": jnp.zeros((embd_dim,), jnp.float32),
        }

    for _ in range(n_layers):
        params["layers"].append({
            "self_attn": self_attn_params(),
            "cross_attn": cross_attn_params(),
            "ln1_g": jnp.ones((embd_dim,), jnp.float32), "ln1_b": jnp.zeros((embd_dim,), jnp.float32),
            "ln2_g": jnp.ones((embd_dim,), jnp.float32), "ln2_b": jnp.zeros((embd_dim,), jnp.float32),
            "ln3_g": jnp.ones((embd_dim,), jnp.float32), "ln3_b": jnp.zeros((embd_dim,), jnp.float32),
            "ffn_w1": w((embd_dim, hidden_dim)), "ffn_b1": jnp.zeros((hidden_dim,), jnp.float32),
            "ffn_w2": w((hidden_dim, embd_dim)), "ffn_b2": jnp.zeros((embd_dim,), jnp.float32),
        })
    return params


if __name__ == "__main__":
    # Small shapes consistent with the module.
    B, S_dec, S_enc = 2, 8, 8
    src_vocab, embd_dim, pad_idx = 50, 32, 0
    n_heads, n_layers, dk, dv, hidden_dim = 2, 2, 16, 16, 64
    seq_len = 200

    key = jax.random.PRNGKey(0)
    k_params, k_inp, k_enc = jax.random.split(key, 3)

    params = init_params(k_params, src_vocab, embd_dim, pad_idx, n_heads,
                         n_layers, dk, dv, hidden_dim, seq_len)

    dec_input = jax.random.randint(k_inp, (B, S_dec), 0, src_vocab, dtype=jnp.int32)
    enc_output = jax.random.normal(k_enc, (B, S_enc, embd_dim), jnp.float32)

    fwd = jax.jit(functools.partial(decoder_forward, n_heads=n_heads, dk=dk, dv=dv,
                                    scale_emb=False))
    out = fwd(params, dec_input, enc_output)
    out = jax.block_until_ready(out)
    assert out.shape == (B, S_dec, embd_dim)
    assert bool(jnp.all(jnp.isfinite(out)))
    print("KERNEL_OK")
</pallas_src>

<mosaic_0001>
module attributes {stable_mosaic.version = 11 : i64} {
  func.func @_embed_ln_kernel(%arg0: i32, %arg1: memref<1x8x32xf32, #tpu.memory_space<vmem>>, %arg2: memref<8x32xf32, #tpu.memory_space<vmem>>, %arg3: memref<1x32xf32, #tpu.memory_space<vmem>>, %arg4: memref<1x32xf32, #tpu.memory_space<vmem>>, %arg5: memref<1x8x32xf32, #tpu.memory_space<vmem>>) attributes {dimension_semantics = [#tpu.dimension_semantics<parallel>], iteration_bounds = array<i64: 2>, scalar_prefetch = 0 : i64, scratch_operands = 0 : i64, tpu.core_type = #tpu.core_type<tc>, window_params = [{transform_indices = @transform_0, window_bounds = array<i64: 1, 8, 32>}, {pipeline_mode = #tpu.pipeline_mode<synchronous>, transform_indices = @transform_1, window_bounds = array<i64: 8, 32>}, {pipeline_mode = #tpu.pipeline_mode<synchronous>, transform_indices = @transform_2, window_bounds = array<i64: 1, 32>}, {pipeline_mode = #tpu.pipeline_mode<synchronous>, transform_indices = @transform_3, window_bounds = array<i64: 1, 32>}, {transform_indices = @transform_4, window_bounds = array<i64: 1, 8, 32>}]} {
    %c0 = arith.constant 0 : index
    %c0_0 = arith.constant 0 : index
    %c0_1 = arith.constant 0 : index
    %0 = vector.load %arg1[%c0, %c0_0, %c0_1] : memref<1x8x32xf32, #tpu.memory_space<vmem>>, vector<1x8x32xf32>
    %1 = vector.shape_cast %0 : vector<1x8x32xf32> to vector<8x32xf32>
    %c0_2 = arith.constant 0 : index
    %c0_3 = arith.constant 0 : index
    %2 = vector.load %arg2[%c0_2, %c0_3] : memref<8x32xf32, #tpu.memory_space<vmem>>, vector<8x32xf32>
    %3 = arith.addf %1, %2 : vector<8x32xf32>
    %cst = arith.constant dense<0.000000e+00> : vector<8xf32>
    %4 = vector.multi_reduction <add>, %3, %cst [1] : vector<8x32xf32> to vector<8xf32>
    %5 = vector.shape_cast %4 : vector<8xf32> to vector<8x1xf32>
    %cst_4 = arith.constant 3.200000e+01 : f32
    %6 = vector.broadcast %cst_4 : f32 to vector<8x1xf32>
    %7 = arith.divf %5, %6 : vector<8x1xf32>
    %8 = vector.broadcast %7 : vector<8x1xf32> to vector<8x32xf32>
    %9 = arith.subf %3, %8 : vector<8x32xf32>
    %10 = arith.mulf %9, %9 : vector<8x32xf32>
    %cst_5 = arith.constant dense<0.000000e+00> : vector<8xf32>
    %11 = vector.multi_reduction <add>, %10, %cst_5 [1] : vector<8x32xf32> to vector<8xf32>
    %12 = vector.shape_cast %11 : vector<8xf32> to vector<8x1xf32>
    %cst_6 = arith.constant 3.200000e+01 : f32
    %13 = vector.broadcast %cst_6 : f32 to vector<8x1xf32>
    %14 = arith.divf %12, %13 : vector<8x1xf32>
    %15 = vector.broadcast %7 : vector<8x1xf32> to vector<8x32xf32>
    %16 = arith.subf %3, %15 : vector<8x32xf32>
    %cst_7 = arith.constant 9.99999971E-10 : f32
    %17 = vector.broadcast %cst_7 : f32 to vector<8x1xf32>
    %18 = arith.addf %14, %17 : vector<8x1xf32>
    %19 = math.rsqrt %18 : vector<8x1xf32>
    %20 = vector.broadcast %19 : vector<8x1xf32> to vector<8x32xf32>
    %21 = arith.mulf %16, %20 : vector<8x32xf32>
    %c0_8 = arith.constant 0 : index
    %c0_9 = arith.constant 0 : index
    %22 = vector.load %arg3[%c0_8, %c0_9] : memref<1x32xf32, #tpu.memory_space<vmem>>, vector<1x32xf32>
    %23 = vector.broadcast %22 : vector<1x32xf32> to vector<8x32xf32>
    %24 = arith.mulf %21, %23 : vector<8x32xf32>
    %c0_10 = arith.constant 0 : index
    %c0_11 = arith.constant 0 : index
    %25 = vector.load %arg4[%c0_10, %c0_11] : memref<1x32xf32, #tpu.memory_space<vmem>>, vector<1x32xf32>
    %26 = vector.broadcast %25 : vector<1x32xf32> to vector<8x32xf32>
    %27 = arith.addf %24, %26 : vector<8x32xf32>
    %c0_12 = arith.constant 0 : index
    %c0_13 = arith.constant 0 : index
    %c0_14 = arith.constant 0 : index
    %28 = vector.load %arg5[%c0_12, %c0_13, %c0_14] : memref<1x8x32xf32, #tpu.memory_space<vmem>>, vector<1x8x32xf32>
    %29 = vector.shape_cast %28 : vector<1x8x32xf32> to vector<8x32xf32>
    %30 = vector.shape_cast %27 : vector<8x32xf32> to vector<1x8x32xf32>
    tpu.vector_store %arg5[%c0_12, %c0_13, %c0_14], %30 {strides = array<i32>} : memref<1x8x32xf32, #tpu.memory_space<vmem>>, vector<1x8x32xf32>,
    return
  }
  func.func @transform_0(%arg0: i32) -> (i32, i32, i32) {
    %c0_i32 = arith.constant 0 : i32
    %c0_i32_0 = arith.constant 0 : i32
    %c0_i32_1 = arith.constant 0 : i32
    return %arg0, %c0_i32, %c0_i32_0 : i32, i32, i32
  }
  func.func @transform_1(%arg0: i32) -> (i32, i32) {
    %c0_i32 = arith.constant 0 : i32
    %c0_i32_0 = arith.constant 0 : i32
    %c0_i32_1 = arith.constant 0 : i32
    return %c0_i32, %c0_i32_0 : i32, i32
  }
  func.func @transform_2(%arg0: i32) -> (i32, i32) {
    %c0_i32 = arith.constant 0 : i32
    %c0_i32_0 = arith.constant 0 : i32
    %c0_i32_1 = arith.constant 0 : i32
    return %c0_i32, %c0_i32_0 : i32, i32
  }
  func.func @transform_3(%arg0: i32) -> (i32, i32) {
    %c0_i32 = arith.constant 0 : i32
    %c0_i32_0 = arith.constant 0 : i32
    %c0_i32_1 = arith.constant 0 : i32
    return %c0_i32, %c0_i32_0 : i32, i32
  }
  func.func @transform_4(%arg0: i32) -> (i32, i32, i32) {
    %c0_i32 = arith.constant 0 : i32
    %c0_i32_0 = arith.constant 0 : i32
    %c0_i32_1 = arith.constant 0 : i32
    return %arg0, %c0_i32, %c0_i32_0 : i32, i32, i32
  }
}

module attributes {stable_mosaic.version = 11 : i64} {
  func.func @_matmul_bias_kernel(%arg0: i32, %arg1: i32, %arg2: i32, %arg3: memref<16x32xf32, #tpu.memory_space<vmem>>, %arg4: memref<32x96xf32, #tpu.memory_space<vmem>>, %arg5: memref<1x96xf32, #tpu.memory_space<vmem>>, %arg6: memref<16x96xf32, #tpu.memory_space<vmem>>, %arg7: memref<16x96xf32, #tpu.memory_space<vmem>>) attributes {dimension_semantics = [#tpu.dimension_semantics<parallel>, #tpu.dimension_semantics<parallel>, #tpu.dimension_semantics<arbitrary>], iteration_bounds = array<i64: 1, 1, 1>, scalar_prefetch = 0 : i64, scratch_operands = 1 : i64, tpu.core_type = #tpu.core_type<tc>, window_params = [{transform_indices = @transform_0, window_bounds = array<i64: 16, 32>}, {transform_indices = @transform_1, window_bounds = array<i64: 32, 96>}, {transform_indices = @transform_2, window_bounds = array<i64: 1, 96>}, {transform_indices = @transform_3, window_bounds = array<i64: 16, 96>}]} {
    %c0_i32 = arith.constant 0 : i32
    %0 = arith.cmpi eq, %arg2, %c0_i32 : i32
    %1 = arith.extui %0 : i1 to i32
    %c0_i32_0 = arith.constant 0 : i32
    %2 = arith.cmpi ne, %1, %c0_i32_0 : i32
    scf.if %2 {
      %cst_10 = arith.constant 0.000000e+00 : f32
      %12 = vector.broadcast %cst_10 : f32 to vector<16x96xf32>
      %c0_11 = arith.constant 0 : index
      %c0_12 = arith.constant 0 : index
      %13 = vector.load %arg7[%c0_11, %c0_12] : memref<16x96xf32, #tpu.memory_space<vmem>>, vector<16x96xf32>
      tpu.vector_store %arg7[%c0_11, %c0_12], %12 {strides = array<i32>} : memref<16x96xf32, #tpu.memory_space<vmem>>, vector<16x96xf32>,
    } else {
    }
    %c0 = arith.constant 0 : index
    %c0_1 = arith.constant 0 : index
    %3 = vector.load %arg7[%c0, %c0_1] : memref<16x96xf32, #tpu.memory_space<vmem>>, vector<16x96xf32>
    %c0_2 = arith.constant 0 : index
    %c0_3 = arith.constant 0 : index
    %4 = vector.load %arg3[%c0_2, %c0_3] : memref<16x32xf32, #tpu.memory_space<vmem>>, vector<16x32xf32>
    %c0_4 = arith.constant 0 : index
    %c0_5 = arith.constant 0 : index
    %5 = vector.load %arg4[%c0_4, %c0_5] : memref<32x96xf32, #tpu.memory_space<vmem>>, vector<32x96xf32>
    %cst = arith.constant dense<0.000000e+00> : vector<16x96xf32>
    %6 = tpu.matmul %4, %5, %cst {dimension_numbers = #tpu.dot_dimension_numbers<[1], [0], [0], [1], [0, 0, 1, 1], [], []>} : vector<16x32xf32>, vector<32x96xf32>, vector<16x96xf32> -> vector<16x96xf32>
    %7 = arith.addf %3, %6 : vector<16x96xf32>
    %c0_6 = arith.constant 0 : index
    %c0_7 = arith.constant 0 : index
    %8 = vector.load %arg7[%c0_6, %c0_7] : memref<16x96xf32, #tpu.memory_space<vmem>>, vector<16x96xf32>
    tpu.vector_store %arg7[%c0_6, %c0_7], %7 {strides = array<i32>} : memref<16x96xf32, #tpu.memory_space<vmem>>, vector<16x96xf32>,
    %c0_i32_8 = arith.constant 0 : i32
    %9 = arith.cmpi eq, %arg2, %c0_i32_8 : i32
    %10 = arith.extui %9 : i1 to i32
    %c0_i32_9 = arith.constant 0 : i32
    %11 = arith.cmpi ne, %10, %c0_i32_9 : i32
    scf.if %11 {
      %c0_10 = arith.constant 0 : index
      %c0_11 = arith.constant 0 : index
      %12 = vector.load %arg7[%c0_10, %c0_11] : memref<16x96xf32, #tpu.memory_space<vmem>>, vector<16x96xf32>
      %c0_12 = arith.constant 0 : index
      %c0_13 = arith.constant 0 : index
      %13 = vector.load %arg5[%c0_12, %c0_13] : memref<1x96xf32, #tpu.memory_space<vmem>>, vector<1x96xf32>
      %14 = vector.broadcast %13 : vector<1x96xf32> to vector<16x96xf32>
      %15 = arith.addf %12, %14 : vector<16x96xf32>
      %c0_14 = arith.constant 0 : index
      %c0_15 = arith.constant 0 : index
      %16 = vector.load %arg6[%c0_14, %c0_15] : memref<16x96xf32, #tpu.memory_space<vmem>>, vector<16x96xf32>
      tpu.vector_store %arg6[%c0_14, %c0_15], %15 {strides = array<i32>} : memref<16x96xf32, #tpu.memory_space<vmem>>, vector<16x96xf32>,
    } else {
    }
    return
  }
  func.func @transform_0(%arg0: i32, %arg1: i32, %arg2: i32) -> (i32, i32) {
    %c0_i32 = arith.constant 0 : i32
    return %arg0, %arg2 : i32, i32
  }
  func.func @transform_1(%arg0: i32, %arg1: i32, %arg2: i32) -> (i32, i32) {
    %c0_i32 = arith.constant 0 : i32
    return %arg2, %arg1 : i32, i32
  }
  func.func @transform_2(%arg0: i32, %arg1: i32, %arg2: i32) -> (i32, i32) {
    %c0_i32 = arith.constant 0 : i32
    %c0_i32_0 = arith.constant 0 : i32
    return %c0_i32, %arg1 : i32, i32
  }
  func.func @transform_3(%arg0: i32, %arg1: i32, %arg2: i32) -> (i32, i32) {
    %c0_i32 = arith.constant 0 : i32
    return %arg0, %arg1 : i32, i32
  }
}

module attributes {stable_mosaic.version = 11 : i64} {
  func.func @_attention_kernel(%arg0: i32, %arg1: memref<1x8x32xf32, #tpu.memory_space<vmem>>, %arg2: memref<1x8x32xf32, #tpu.memory_space<vmem>>, %arg3: memref<1x8x32xf32, #tpu.memory_space<vmem>>, %arg4: memref<1x8x32xf32, #tpu.memory_space<vmem>>) attributes {dimension_semantics = [#tpu.dimension_semantics<parallel>], iteration_bounds = array<i64: 2>, scalar_prefetch = 0 : i64, scratch_operands = 0 : i64, tpu.core_type = #tpu.core_type<tc>, window_params = [{transform_indices = @transform_0, window_bounds = array<i64: 1, 8, 32>}, {transform_indices = @transform_1, window_bounds = array<i64: 1, 8, 32>}, {transform_indices = @transform_2, window_bounds = array<i64: 1, 8, 32>}, {transform_indices = @transform_3, window_bounds = array<i64: 1, 8, 32>}]} {
    %c0 = arith.constant 0 : index
    %c0_0 = arith.constant 0 : index
    %c0_1 = arith.constant 0 : index
    %0 = vector.load %arg1[%c0, %c0_0, %c0_1] : memref<1x8x32xf32, #tpu.memory_space<vmem>>, vector<1x8x32xf32>
    %1 = vector.shape_cast %0 : vector<1x8x32xf32> to vector<8x32xf32>
    %cst = arith.constant 2.500000e-01 : f32
    %2 = vector.broadcast %cst : f32 to vector<8x32xf32>
    %3 = arith.mulf %1, %2 : vector<8x32xf32>
    %c0_2 = arith.constant 0 : index
    %c0_3 = arith.constant 0 : index
    %c0_4 = arith.constant 0 : index
    %4 = vector.load %arg2[%c0_2, %c0_3, %c0_4] : memref<1x8x32xf32, #tpu.memory_space<vmem>>, vector<1x8x32xf32>
    %5 = vector.shape_cast %4 : vector<1x8x32xf32> to vector<8x32xf32>
    %c0_5 = arith.constant 0 : index
    %c0_6 = arith.constant 0 : index
    %c0_7 = arith.constant 0 : index
    %6 = vector.load %arg3[%c0_5, %c0_6, %c0_7] : memref<1x8x32xf32, #tpu.memory_space<vmem>>, vector<1x8x32xf32>
    %7 = vector.shape_cast %6 : vector<1x8x32xf32> to vector<8x32xf32>
    %8 = vector.extract_strided_slice %3 {offsets = [0, 0], sizes = [8, 16], strides = [1, 1]} : vector<8x32xf32> to vector<8x16xf32>
    %9 = vector.extract_strided_slice %5 {offsets = [0, 0], sizes = [8, 16], strides = [1, 1]} : vector<8x32xf32> to vector<8x16xf32>
    %10 = vector.extract_strided_slice %7 {offsets = [0, 0], sizes = [8, 16], strides = [1, 1]} : vector<8x32xf32> to vector<8x16xf32>
    %cst_8 = arith.constant dense<0.000000e+00> : vector<8x8xf32>
    %11 = tpu.matmul %8, %9, %cst_8 {dimension_numbers = #tpu.dot_dimension_numbers<[1], [1], [0], [0], [0, 0, 1, 0], [], []>} : vector<8x16xf32>, vector<8x16xf32>, vector<8x8xf32> -> vector<8x8xf32>
    %cst_9 = arith.constant dense<0xFF800000> : vector<8xf32>
    %12 = vector.multi_reduction <maximumf>, %11, %cst_9 [1] : vector<8x8xf32> to vector<8xf32>
    %13 = vector.shape_cast %12 : vector<8xf32> to vector<8x1xf32>
    %14 = vector.broadcast %13 : vector<8x1xf32> to vector<8x8xf32>
    %15 = arith.subf %11, %14 : vector<8x8xf32>
    %16 = math.exp %15 : vector<8x8xf32>
    %cst_10 = arith.constant dense<0.000000e+00> : vector<8xf32>
    %17 = vector.multi_reduction <add>, %16, %cst_10 [1] : vector<8x8xf32> to vector<8xf32>
    %18 = vector.shape_cast %17 : vector<8xf32> to vector<8x1xf32>
    %19 = tpu.reciprocal %18 {approx = true} : vector<8x1xf32> -> vector<8x1xf32>
    %20 = vector.broadcast %19 : vector<8x1xf32> to vector<8x8xf32>
    %21 = arith.mulf %16, %20 : vector<8x8xf32>
    %cst_11 = arith.constant dense<0.000000e+00> : vector<8x16xf32>
    %22 = tpu.matmul %21, %10, %cst_11 {dimension_numbers = #tpu.dot_dimension_numbers<[1], [0], [0], [1], [0, 0, 1, 1], [], []>} : vector<8x8xf32>, vector<8x16xf32>, vector<8x16xf32> -> vector<8x16xf32>
    %23 = vector.extract_strided_slice %3 {offsets = [0, 16], sizes = [8, 16], strides = [1, 1]} : vector<8x32xf32> to vector<8x16xf32>
    %24 = vector.extract_strided_slice %5 {offsets = [0, 16], sizes = [8, 16], strides = [1, 1]} : vector<8x32xf32> to vector<8x16xf32>
    %25 = vector.extract_strided_slice %7 {offsets = [0, 16], sizes = [8, 16], strides = [1, 1]} : vector<8x32xf32> to vector<8x16xf32>
    %cst_12 = arith.constant dense<0.000000e+00> : vector<8x8xf32>
    %26 = tpu.matmul %23, %24, %cst_12 {dimension_numbers = #tpu.dot_dimension_numbers<[1], [1], [0], [0], [0, 0, 1, 0], [], []>} : vector<8x16xf32>, vector<8x16xf32>, vector<8x8xf32> -> vector<8x8xf32>
    %cst_13 = arith.constant dense<0xFF800000> : vector<8xf32>
    %27 = vector.multi_reduction <maximumf>, %26, %cst_13 [1] : vector<8x8xf32> to vector<8xf32>
    %28 = vector.shape_cast %27 : vector<8xf32> to vector<8x1xf32>
    %29 = vector.broadcast %28 : vector<8x1xf32> to vector<8x8xf32>
    %30 = arith.subf %26, %29 : vector<8x8xf32>
    %31 = math.exp %30 : vector<8x8xf32>
    %cst_14 = arith.constant dense<0.000000e+00> : vector<8xf32>
    %32 = vector.multi_reduction <add>, %31, %cst_14 [1] : vector<8x8xf32> to vector<8xf32>
    %33 = vector.shape_cast %32 : vector<8xf32> to vector<8x1xf32>
    %34 = tpu.reciprocal %33 {approx = true} : vector<8x1xf32> -> vector<8x1xf32>
    %35 = vector.broadcast %34 : vector<8x1xf32> to vector<8x8xf32>
    %36 = arith.mulf %31, %35 : vector<8x8xf32>
    %cst_15 = arith.constant dense<0.000000e+00> : vector<8x16xf32>
    %37 = tpu.matmul %36, %25, %cst_15 {dimension_numbers = #tpu.dot_dimension_numbers<[1], [0], [0], [1], [0, 0, 1, 1], [], []>} : vector<8x8xf32>, vector<8x16xf32>, vector<8x16xf32> -> vector<8x16xf32>
    %38 = tpu.concatenate %22, %37 in 1 : vector<8x16xf32>, vector<8x16xf32> -> vector<8x32xf32>
    %c0_16 = arith.constant 0 : index
    %c0_17 = arith.constant 0 : index
    %c0_18 = arith.constant 0 : index
    %39 = vector.load %arg4[%c0_16, %c0_17, %c0_18] : memref<1x8x32xf32, #tpu.memory_space<vmem>>, vector<1x8x32xf32>
    %40 = vector.shape_cast %39 : vector<1x8x32xf32> to vector<8x32xf32>
    %41 = vector.shape_cast %38 : vector<8x32xf32> to vector<1x8x32xf32>
    tpu.vector_store %arg4[%c0_16, %c0_17, %c0_18], %41 {strides = array<i32>} : memref<1x8x32xf32, #tpu.memory_space<vmem>>, vector<1x8x32xf32>,
    return
  }
  func.func @transform_0(%arg0: i32) -> (i32, i32, i32) {
    %c0_i32 = arith.constant 0 : i32
    %c0_i32_0 = arith.constant 0 : i32
    %c0_i32_1 = arith.constant 0 : i32
    return %arg0, %c0_i32, %c0_i32_0 : i32, i32, i32
  }
  func.func @transform_1(%arg0: i32) -> (i32, i32, i32) {
    %c0_i32 = arith.constant 0 : i32
    %c0_i32_0 = arith.constant 0 : i32
    %c0_i32_1 = arith.constant 0 : i32
    return %arg0, %c0_i32, %c0_i32_0 : i32, i32, i32
  }
  func.func @transform_2(%arg0: i32) -> (i32, i32, i32) {
    %c0_i32 = arith.constant 0 : i32
    %c0_i32_0 = arith.constant 0 : i32
    %c0_i32_1 = arith.constant 0 : i32
    return %arg0, %c0_i32, %c0_i32_0 : i32, i32, i32
  }
  func.func @transform_3(%arg0: i32) -> (i32, i32, i32) {
    %c0_i32 = arith.constant 0 : i32
    %c0_i32_0 = arith.constant 0 : i32
    %c0_i32_1 = arith.constant 0 : i32
    return %arg0, %c0_i32, %c0_i32_0 : i32, i32, i32
  }
}

module attributes {stable_mosaic.version = 11 : i64} {
  func.func @_linear_add_ln_kernel(%arg0: i32, %arg1: memref<16x32xf32, #tpu.memory_space<vmem>>, %arg2: memref<32x32xf32, #tpu.memory_space<vmem>>, %arg3: memref<1x32xf32, #tpu.memory_space<vmem>>, %arg4: memref<16x32xf32, #tpu.memory_space<vmem>>, %arg5: memref<1x32xf32, #tpu.memory_space<vmem>>, %arg6: memref<1x32xf32, #tpu.memory_space<vmem>>, %arg7: memref<16x32xf32, #tpu.memory_space<vmem>>) attributes {dimension_semantics = [#tpu.dimension_semantics<parallel>], iteration_bounds = array<i64: 1>, scalar_prefetch = 0 : i64, scratch_operands = 0 : i64, tpu.core_type = #tpu.core_type<tc>, window_params = [{transform_indices = @transform_0, window_bounds = array<i64: 16, 32>}, {pipeline_mode = #tpu.pipeline_mode<synchronous>, transform_indices = @transform_1, window_bounds = array<i64: 32, 32>}, {pipeline_mode = #tpu.pipeline_mode<synchronous>, transform_indices = @transform_2, window_bounds = array<i64: 1, 32>}, {transform_indices = @transform_3, window_bounds = array<i64: 16, 32>}, {pipeline_mode = #tpu.pipeline_mode<synchronous>, transform_indices = @transform_4, window_bounds = array<i64: 1, 32>}, {pipeline_mode = #tpu.pipeline_mode<synchronous>, transform_indices = @transform_5, window_bounds = array<i64: 1, 32>}, {transform_indices = @transform_6, window_bounds = array<i64: 16, 32>}]} {
    %c0 = arith.constant 0 : index
    %c0_0 = arith.constant 0 : index
    %0 = vector.load %arg1[%c0, %c0_0] : memref<16x32xf32, #tpu.memory_space<vmem>>, vector<16x32xf32>
    %c0_1 = arith.constant 0 : index
    %c0_2 = arith.constant 0 : index
    %1 = vector.load %arg2[%c0_1, %c0_2] : memref<32x32xf32, #tpu.memory_space<vmem>>, vector<32x32xf32>
    %cst = arith.constant dense<0.000000e+00> : vector<16x32xf32>
    %2 = tpu.matmul %0, %1, %cst {dimension_numbers = #tpu.dot_dimension_numbers<[1], [0], [0], [1], [0, 0, 1, 1], [], []>} : vector<16x32xf32>, vector<32x32xf32>, vector<16x32xf32> -> vector<16x32xf32>
    %c0_3 = arith.constant 0 : index
    %c0_4 = arith.constant 0 : index
    %3 = vector.load %arg3[%c0_3, %c0_4] : memref<1x32xf32, #tpu.memory_space<vmem>>, vector<1x32xf32>
    %4 = vector.broadcast %3 : vector<1x32xf32> to vector<16x32xf32>
    %5 = arith.addf %2, %4 : vector<16x32xf32>
    %c0_5 = arith.constant 0 : index
    %c0_6 = arith.constant 0 : index
    %6 = vector.load %arg4[%c0_5, %c0_6] : memref<16x32xf32, #tpu.memory_space<vmem>>, vector<16x32xf32>
    %7 = arith.addf %5, %6 : vector<16x32xf32>
    %cst_7 = arith.constant dense<0.000000e+00> : vector<16xf32>
    %8 = vector.multi_reduction <add>, %7, %cst_7 [1] : vector<16x32xf32> to vector<16xf32>
    %9 = vector.shape_cast %8 : vector<16xf32> to vector<16x1xf32>
    %cst_8 = arith.constant 3.200000e+01 : f32
    %10 = vector.broadcast %cst_8 : f32 to vector<16x1xf32>
    %11 = arith.divf %9, %10 : vector<16x1xf32>
    %12 = vector.broadcast %11 : vector<16x1xf32> to vector<16x32xf32>
    %13 = arith.subf %7, %12 : vector<16x32xf32>
    %14 = arith.mulf %13, %13 : vector<16x32xf32>
    %cst_9 = arith.constant dense<0.000000e+00> : vector<16xf32>
    %15 = vector.multi_reduction <add>, %14, %cst_9 [1] : vector<16x32xf32> to vector<16xf32>
    %16 = vector.shape_cast %15 : vector<16xf32> to vector<16x1xf32>
    %cst_10 = arith.constant 3.200000e+01 : f32
    %17 = vector.broadcast %cst_10 : f32 to vector<16x1xf32>
    %18 = arith.divf %16, %17 : vector<16x1xf32>
    %19 = vector.broadcast %11 : vector<16x1xf32> to vector<16x32xf32>
    %20 = arith.subf %7, %19 : vector<16x32xf32>
    %cst_11 = arith.constant 9.99999997E-7 : f32
    %21 = vector.broadcast %cst_11 : f32 to vector<16x1xf32>
    %22 = arith.addf %18, %21 : vector<16x1xf32>
    %23 = math.rsqrt %22 : vector<16x1xf32>
    %24 = vector.broadcast %23 : vector<16x1xf32> to vector<16x32xf32>
    %25 = arith.mulf %20, %24 : vector<16x32xf32>
    %c0_12 = arith.constant 0 : index
    %c0_13 = arith.constant 0 : index
    %26 = vector.load %arg5[%c0_12, %c0_13] : memref<1x32xf32, #tpu.memory_space<vmem>>, vector<1x32xf32>
    %27 = vector.broadcast %26 : vector<1x32xf32> to vector<16x32xf32>
    %28 = arith.mulf %25, %27 : vector<16x32xf32>
    %c0_14 = arith.constant 0 : index
    %c0_15 = arith.constant 0 : index
    %29 = vector.load %arg6[%c0_14, %c0_15] : memref<1x32xf32, #tpu.memory_space<vmem>>, vector<1x32xf32>
    %30 = vector.broadcast %29 : vector<1x32xf32> to vector<16x32xf32>
    %31 = arith.addf %28, %30 : vector<16x32xf32>
    %c0_16 = arith.constant 0 : index
    %c0_17 = arith.constant 0 : index
    %32 = vector.load %arg7[%c0_16, %c0_17] : memref<16x32xf32, #tpu.memory_space<vmem>>, vector<16x32xf32>
    tpu.vector_store %arg7[%c0_16, %c0_17], %31 {strides = array<i32>} : memref<16x32xf32, #tpu.memory_space<vmem>>, vector<16x32xf32>,
    return
  }
  func.func @transform_0(%arg0: i32) -> (i32, i32) {
    %c0_i32 = arith.constant 0 : i32
    %c0_i32_0 = arith.constant 0 : i32
    return %arg0, %c0_i32 : i32, i32
  }
  func.func @transform_1(%arg0: i32) -> (i32, i32) {
    %c0_i32 = arith.constant 0 : i32
    %c0_i32_0 = arith.constant 0 : i32
    %c0_i32_1 = arith.constant 0 : i32
    return %c0_i32, %c0_i32_0 : i32, i32
  }
  func.func @transform_2(%arg0: i32) -> (i32, i32) {
    %c0_i32 = arith.constant 0 : i32
    %c0_i32_0 = arith.constant 0 : i32
    %c0_i32_1 = arith.constant 0 : i32
    return %c0_i32, %c0_i32_0 : i32, i32
  }
  func.func @transform_3(%arg0: i32) -> (i32, i32) {
    %c0_i32 = arith.constant 0 : i32
    %c0_i32_0 = arith.constant 0 : i32
    return %arg0, %c0_i32 : i32, i32
  }
  func.func @transform_4(%arg0: i32) -> (i32, i32) {
    %c0_i32 = arith.constant 0 : i32
    %c0_i32_0 = arith.constant 0 : i32
    %c0_i32_1 = arith.constant 0 : i32
    return %c0_i32, %c0_i32_0 : i32, i32
  }
  func.func @transform_5(%arg0: i32) -> (i32, i32) {
    %c0_i32 = arith.constant 0 : i32
    %c0_i32_0 = arith.constant 0 : i32
    %c0_i32_1 = arith.constant 0 : i32
    return %c0_i32, %c0_i32_0 : i32, i32
  }
  func.func @transform_6(%arg0: i32) -> (i32, i32) {
    %c0_i32 = arith.constant 0 : i32
    %c0_i32_0 = arith.constant 0 : i32
    return %arg0, %c0_i32 : i32, i32
  }
}

module attributes {stable_mosaic.version = 11 : i64} {
  func.func @_matmul_bias_kernel(%arg0: i32, %arg1: i32, %arg2: i32, %arg3: memref<16x32xf32, #tpu.memory_space<vmem>>, %arg4: memref<32x32xf32, #tpu.memory_space<vmem>>, %arg5: memref<1x32xf32, #tpu.memory_space<vmem>>, %arg6: memref<16x32xf32, #tpu.memory_space<vmem>>, %arg7: memref<16x32xf32, #tpu.memory_space<vmem>>) attributes {dimension_semantics = [#tpu.dimension_semantics<parallel>, #tpu.dimension_semantics<parallel>, #tpu.dimension_semantics<arbitrary>], iteration_bounds = array<i64: 1, 1, 1>, scalar_prefetch = 0 : i64, scratch_operands = 1 : i64, tpu.core_type = #tpu.core_type<tc>, window_params = [{transform_indices = @transform_0, window_bounds = array<i64: 16, 32>}, {transform_indices = @transform_1, window_bounds = array<i64: 32, 32>}, {transform_indices = @transform_2, window_bounds = array<i64: 1, 32>}, {transform_indices = @transform_3, window_bounds = array<i64: 16, 32>}]} {
    %c0_i32 = arith.constant 0 : i32
    %0 = arith.cmpi eq, %arg2, %c0_i32 : i32
    %1 = arith.extui %0 : i1 to i32
    %c0_i32_0 = arith.constant 0 : i32
    %2 = arith.cmpi ne, %1, %c0_i32_0 : i32
    scf.if %2 {
      %cst_10 = arith.constant 0.000000e+00 : f32
      %12 = vector.broadcast %cst_10 : f32 to vector<16x32xf32>
      %c0_11 = arith.constant 0 : index
      %c0_12 = arith.constant 0 : index
      %13 = vector.load %arg7[%c0_11, %c0_12] : memref<16x32xf32, #tpu.memory_space<vmem>>, vector<16x32xf32>
      tpu.vector_store %arg7[%c0_11, %c0_12], %12 {strides = array<i32>} : memref<16x32xf32, #tpu.memory_space<vmem>>, vector<16x32xf32>,
    } else {
    }
    %c0 = arith.constant 0 : index
    %c0_1 = arith.constant 0 : index
    %3 = vector.load %arg7[%c0, %c0_1] : memref<16x32xf32, #tpu.memory_space<vmem>>, vector<16x32xf32>
    %c0_2 = arith.constant 0 : index
    %c0_3 = arith.constant 0 : index
    %4 = vector.load %arg3[%c0_2, %c0_3] : memref<16x32xf32, #tpu.memory_space<vmem>>, vector<16x32xf32>
    %c0_4 = arith.constant 0 : index
    %c0_5 = arith.constant 0 : index
    %5 = vector.load %arg4[%c0_4, %c0_5] : memref<32x32xf32, #tpu.memory_space<vmem>>, vector<32x32xf32>
    %cst = arith.constant dense<0.000000e+00> : vector<16x32xf32>
    %6 = tpu.matmul %4, %5, %cst {dimension_numbers = #tpu.dot_dimension_numbers<[1], [0], [0], [1], [0, 0, 1, 1], [], []>} : vector<16x32xf32>, vector<32x32xf32>, vector<16x32xf32> -> vector<16x32xf32>
    %7 = arith.addf %3, %6 : vector<16x32xf32>
    %c0_6 = arith.constant 0 : index
    %c0_7 = arith.constant 0 : index
    %8 = vector.load %arg7[%c0_6, %c0_7] : memref<16x32xf32, #tpu.memory_space<vmem>>, vector<16x32xf32>
    tpu.vector_store %arg7[%c0_6, %c0_7], %7 {strides = array<i32>} : memref<16x32xf32, #tpu.memory_space<vmem>>, vector<16x32xf32>,
    %c0_i32_8 = arith.constant 0 : i32
    %9 = arith.cmpi eq, %arg2, %c0_i32_8 : i32
    %10 = arith.extui %9 : i1 to i32
    %c0_i32_9 = arith.constant 0 : i32
    %11 = arith.cmpi ne, %10, %c0_i32_9 : i32
    scf.if %11 {
      %c0_10 = arith.constant 0 : index
      %c0_11 = arith.constant 0 : index
      %12 = vector.load %arg7[%c0_10, %c0_11] : memref<16x32xf32, #tpu.memory_space<vmem>>, vector<16x32xf32>
      %c0_12 = arith.constant 0 : index
      %c0_13 = arith.constant 0 : index
      %13 = vector.load %arg5[%c0_12, %c0_13] : memref<1x32xf32, #tpu.memory_space<vmem>>, vector<1x32xf32>
      %14 = vector.broadcast %13 : vector<1x32xf32> to vector<16x32xf32>
      %15 = arith.addf %12, %14 : vector<16x32xf32>
      %c0_14 = arith.constant 0 : index
      %c0_15 = arith.constant 0 : index
      %16 = vector.load %arg6[%c0_14, %c0_15] : memref<16x32xf32, #tpu.memory_space<vmem>>, vector<16x32xf32>
      tpu.vector_store %arg6[%c0_14, %c0_15], %15 {strides = array<i32>} : memref<16x32xf32, #tpu.memory_space<vmem>>, vector<16x32xf32>,
    } else {
    }
    return
  }
  func.func @transform_0(%arg0: i32, %arg1: i32, %arg2: i32) -> (i32, i32) {
    %c0_i32 = arith.constant 0 : i32
    return %arg0, %arg2 : i32, i32
  }
  func.func @transform_1(%arg0: i32, %arg1: i32, %arg2: i32) -> (i32, i32) {
    %c0_i32 = arith.constant 0 : i32
    return %arg2, %arg1 : i32, i32
  }
  func.func @transform_2(%arg0: i32, %arg1: i32, %arg2: i32) -> (i32, i32) {
    %c0_i32 = arith.constant 0 : i32
    %c0_i32_0 = arith.constant 0 : i32
    return %c0_i32, %arg1 : i32, i32
  }
  func.func @transform_3(%arg0: i32, %arg1: i32, %arg2: i32) -> (i32, i32) {
    %c0_i32 = arith.constant 0 : i32
    return %arg0, %arg1 : i32, i32
  }
}

module attributes {stable_mosaic.version = 11 : i64} {
  func.func @_matmul_bias_kernel(%arg0: i32, %arg1: i32, %arg2: i32, %arg3: memref<16x32xf32, #tpu.memory_space<vmem>>, %arg4: memref<32x64xf32, #tpu.memory_space<vmem>>, %arg5: memref<1x64xf32, #tpu.memory_space<vmem>>, %arg6: memref<16x64xf32, #tpu.memory_space<vmem>>, %arg7: memref<16x64xf32, #tpu.memory_space<vmem>>) attributes {dimension_semantics = [#tpu.dimension_semantics<parallel>, #tpu.dimension_semantics<parallel>, #tpu.dimension_semantics<arbitrary>], iteration_bounds = array<i64: 1, 1, 1>, scalar_prefetch = 0 : i64, scratch_operands = 1 : i64, tpu.core_type = #tpu.core_type<tc>, window_params = [{transform_indices = @transform_0, window_bounds = array<i64: 16, 32>}, {transform_indices = @transform_1, window_bounds = array<i64: 32, 64>}, {transform_indices = @transform_2, window_bounds = array<i64: 1, 64>}, {transform_indices = @transform_3, window_bounds = array<i64: 16, 64>}]} {
    %c0_i32 = arith.constant 0 : i32
    %0 = arith.cmpi eq, %arg2, %c0_i32 : i32
    %1 = arith.extui %0 : i1 to i32
    %c0_i32_0 = arith.constant 0 : i32
    %2 = arith.cmpi ne, %1, %c0_i32_0 : i32
    scf.if %2 {
      %cst_10 = arith.constant 0.000000e+00 : f32
      %12 = vector.broadcast %cst_10 : f32 to vector<16x64xf32>
      %c0_11 = arith.constant 0 : index
      %c0_12 = arith.constant 0 : index
      %13 = vector.load %arg7[%c0_11, %c0_12] : memref<16x64xf32, #tpu.memory_space<vmem>>, vector<16x64xf32>
      tpu.vector_store %arg7[%c0_11, %c0_12], %12 {strides = array<i32>} : memref<16x64xf32, #tpu.memory_space<vmem>>, vector<16x64xf32>,
    } else {
    }
    %c0 = arith.constant 0 : index
    %c0_1 = arith.constant 0 : index
    %3 = vector.load %arg7[%c0, %c0_1] : memref<16x64xf32, #tpu.memory_space<vmem>>, vector<16x64xf32>
    %c0_2 = arith.constant 0 : index
    %c0_3 = arith.constant 0 : index
    %4 = vector.load %arg3[%c0_2, %c0_3] : memref<16x32xf32, #tpu.memory_space<vmem>>, vector<16x32xf32>
    %c0_4 = arith.constant 0 : index
    %c0_5 = arith.constant 0 : index
    %5 = vector.load %arg4[%c0_4, %c0_5] : memref<32x64xf32, #tpu.memory_space<vmem>>, vector<32x64xf32>
    %cst = arith.constant dense<0.000000e+00> : vector<16x64xf32>
    %6 = tpu.matmul %4, %5, %cst {dimension_numbers = #tpu.dot_dimension_numbers<[1], [0], [0], [1], [0, 0, 1, 1], [], []>} : vector<16x32xf32>, vector<32x64xf32>, vector<16x64xf32> -> vector<16x64xf32>
    %7 = arith.addf %3, %6 : vector<16x64xf32>
    %c0_6 = arith.constant 0 : index
    %c0_7 = arith.constant 0 : index
    %8 = vector.load %arg7[%c0_6, %c0_7] : memref<16x64xf32, #tpu.memory_space<vmem>>, vector<16x64xf32>
    tpu.vector_store %arg7[%c0_6, %c0_7], %7 {strides = array<i32>} : memref<16x64xf32, #tpu.memory_space<vmem>>, vector<16x64xf32>,
    %c0_i32_8 = arith.constant 0 : i32
    %9 = arith.cmpi eq, %arg2, %c0_i32_8 : i32
    %10 = arith.extui %9 : i1 to i32
    %c0_i32_9 = arith.constant 0 : i32
    %11 = arith.cmpi ne, %10, %c0_i32_9 : i32
    scf.if %11 {
      %c0_10 = arith.constant 0 : index
      %c0_11 = arith.constant 0 : index
      %12 = vector.load %arg7[%c0_10, %c0_11] : memref<16x64xf32, #tpu.memory_space<vmem>>, vector<16x64xf32>
      %c0_12 = arith.constant 0 : index
      %c0_13 = arith.constant 0 : index
      %13 = vector.load %arg5[%c0_12, %c0_13] : memref<1x64xf32, #tpu.memory_space<vmem>>, vector<1x64xf32>
      %14 = vector.broadcast %13 : vector<1x64xf32> to vector<16x64xf32>
      %15 = arith.addf %12, %14 : vector<16x64xf32>
      %c0_14 = arith.constant 0 : index
      %c0_15 = arith.constant 0 : index
      %16 = vector.load %arg6[%c0_14, %c0_15] : memref<16x64xf32, #tpu.memory_space<vmem>>, vector<16x64xf32>
      tpu.vector_store %arg6[%c0_14, %c0_15], %15 {strides = array<i32>} : memref<16x64xf32, #tpu.memory_space<vmem>>, vector<16x64xf32>,
    } else {
    }
    return
  }
  func.func @transform_0(%arg0: i32, %arg1: i32, %arg2: i32) -> (i32, i32) {
    %c0_i32 = arith.constant 0 : i32
    return %arg0, %arg2 : i32, i32
  }
  func.func @transform_1(%arg0: i32, %arg1: i32, %arg2: i32) -> (i32, i32) {
    %c0_i32 = arith.constant 0 : i32
    return %arg2, %arg1 : i32, i32
  }
  func.func @transform_2(%arg0: i32, %arg1: i32, %arg2: i32) -> (i32, i32) {
    %c0_i32 = arith.constant 0 : i32
    %c0_i32_0 = arith.constant 0 : i32
    return %c0_i32, %arg1 : i32, i32
  }
  func.func @transform_3(%arg0: i32, %arg1: i32, %arg2: i32) -> (i32, i32) {
    %c0_i32 = arith.constant 0 : i32
    return %arg0, %arg1 : i32, i32
  }
}

module attributes {stable_mosaic.version = 11 : i64} {
  func.func @_ffn_add_ln_kernel(%arg0: i32, %arg1: memref<16x32xf32, #tpu.memory_space<vmem>>, %arg2: memref<32x64xf32, #tpu.memory_space<vmem>>, %arg3: memref<1x64xf32, #tpu.memory_space<vmem>>, %arg4: memref<64x32xf32, #tpu.memory_space<vmem>>, %arg5: memref<1x32xf32, #tpu.memory_space<vmem>>, %arg6: memref<1x32xf32, #tpu.memory_space<vmem>>, %arg7: memref<1x32xf32, #tpu.memory_space<vmem>>, %arg8: memref<16x32xf32, #tpu.memory_space<vmem>>) attributes {dimension_semantics = [#tpu.dimension_semantics<parallel>], iteration_bounds = array<i64: 1>, scalar_prefetch = 0 : i64, scratch_operands = 0 : i64, tpu.core_type = #tpu.core_type<tc>, window_params = [{transform_indices = @transform_0, window_bounds = array<i64: 16, 32>}, {pipeline_mode = #tpu.pipeline_mode<synchronous>, transform_indices = @transform_1, window_bounds = array<i64: 32, 64>}, {pipeline_mode = #tpu.pipeline_mode<synchronous>, transform_indices = @transform_2, window_bounds = array<i64: 1, 64>}, {pipeline_mode = #tpu.pipeline_mode<synchronous>, transform_indices = @transform_3, window_bounds = array<i64: 64, 32>}, {pipeline_mode = #tpu.pipeline_mode<synchronous>, transform_indices = @transform_4, window_bounds = array<i64: 1, 32>}, {pipeline_mode = #tpu.pipeline_mode<synchronous>, transform_indices = @transform_5, window_bounds = array<i64: 1, 32>}, {pipeline_mode = #tpu.pipeline_mode<synchronous>, transform_indices = @transform_6, window_bounds = array<i64: 1, 32>}, {transform_indices = @transform_7, window_bounds = array<i64: 16, 32>}]} {
    %c0 = arith.constant 0 : index
    %c0_0 = arith.constant 0 : index
    %0 = vector.load %arg1[%c0, %c0_0] : memref<16x32xf32, #tpu.memory_space<vmem>>, vector<16x32xf32>
    %c0_1 = arith.constant 0 : index
    %c0_2 = arith.constant 0 : index
    %1 = vector.load %arg1[%c0_1, %c0_2] : memref<16x32xf32, #tpu.memory_space<vmem>>, vector<16x32xf32>
    %c0_3 = arith.constant 0 : index
    %c0_4 = arith.constant 0 : index
    %2 = vector.load %arg2[%c0_3, %c0_4] : memref<32x64xf32, #tpu.memory_space<vmem>>, vector<32x64xf32>
    %cst = arith.constant dense<0.000000e+00> : vector<16x64xf32>
    %3 = tpu.matmul %1, %2, %cst {dimension_numbers = #tpu.dot_dimension_numbers<[1], [0], [0], [1], [0, 0, 1, 1], [], []>} : vector<16x32xf32>, vector<32x64xf32>, vector<16x64xf32> -> vector<16x64xf32>
    %c0_5 = arith.constant 0 : index
    %c0_6 = arith.constant 0 : index
    %4 = vector.load %arg3[%c0_5, %c0_6] : memref<1x64xf32, #tpu.memory_space<vmem>>, vector<1x64xf32>
    %5 = vector.broadcast %4 : vector<1x64xf32> to vector<16x64xf32>
    %6 = arith.addf %3, %5 : vector<16x64xf32>
    %cst_7 = arith.constant 0.000000e+00 : f32
    %7 = vector.broadcast %cst_7 : f32 to vector<16x64xf32>
    %8 = arith.maximumf %6, %7 : vector<16x64xf32>
    %c0_8 = arith.constant 0 : index
    %c0_9 = arith.constant 0 : index
    %9 = vector.load %arg4[%c0_8, %c0_9] : memref<64x32xf32, #tpu.memory_space<vmem>>, vector<64x32xf32>
    %cst_10 = arith.constant dense<0.000000e+00> : vector<16x32xf32>
    %10 = tpu.matmul %8, %9, %cst_10 {dimension_numbers = #tpu.dot_dimension_numbers<[1], [0], [0], [1], [0, 0, 1, 1], [], []>} : vector<16x64xf32>, vector<64x32xf32>, vector<16x32xf32> -> vector<16x32xf32>
    %c0_11 = arith.constant 0 : index
    %c0_12 = arith.constant 0 : index
    %11 = vector.load %arg5[%c0_11, %c0_12] : memref<1x32xf32, #tpu.memory_space<vmem>>, vector<1x32xf32>
    %12 = vector.broadcast %11 : vector<1x32xf32> to vector<16x32xf32>
    %13 = arith.addf %10, %12 : vector<16x32xf32>
    %14 = arith.addf %13, %0 : vector<16x32xf32>
    %cst_13 = arith.constant dense<0.000000e+00> : vector<16xf32>
    %15 = vector.multi_reduction <add>, %14, %cst_13 [1] : vector<16x32xf32> to vector<16xf32>
    %16 = vector.shape_cast %15 : vector<16xf32> to vector<16x1xf32>
    %cst_14 = arith.constant 3.200000e+01 : f32
    %17 = vector.broadcast %cst_14 : f32 to vector<16x1xf32>
    %18 = arith.divf %16, %17 : vector<16x1xf32>
    %19 = vector.broadcast %18 : vector<16x1xf32> to vector<16x32xf32>
    %20 = arith.subf %14, %19 : vector<16x32xf32>
    %21 = arith.mulf %20, %20 : vector<16x32xf32>
    %cst_15 = arith.constant dense<0.000000e+00> : vector<16xf32>
    %22 = vector.multi_reduction <add>, %21, %cst_15 [1] : vector<16x32xf32> to vector<16xf32>
    %23 = vector.shape_cast %22 : vector<16xf32> to vector<16x1xf32>
    %cst_16 = arith.constant 3.200000e+01 : f32
    %24 = vector.broadcast %cst_16 : f32 to vector<16x1xf32>
    %25 = arith.divf %23, %24 : vector<16x1xf32>
    %26 = vector.broadcast %18 : vector<16x1xf32> to vector<16x32xf32>
    %27 = arith.subf %14, %26 : vector<16x32xf32>
    %cst_17 = arith.constant 9.99999997E-7 : f32
    %28 = vector.broadcast %cst_17 : f32 to vector<16x1xf32>
    %29 = arith.addf %25, %28 : vector<16x1xf32>
    %30 = math.rsqrt %29 : vector<16x1xf32>
    %31 = vector.broadcast %30 : vector<16x1xf32> to vector<16x32xf32>
    %32 = arith.mulf %27, %31 : vector<16x32xf32>
    %c0_18 = arith.constant 0 : index
    %c0_19 = arith.constant 0 : index
    %33 = vector.load %arg6[%c0_18, %c0_19] : memref<1x32xf32, #tpu.memory_space<vmem>>, vector<1x32xf32>
    %34 = vector.broadcast %33 : vector<1x32xf32> to vector<16x32xf32>
    %35 = arith.mulf %32, %34 : vector<16x32xf32>
    %c0_20 = arith.constant 0 : index
    %c0_21 = arith.constant 0 : index
    %36 = vector.load %arg7[%c0_20, %c0_21] : memref<1x32xf32, #tpu.memory_space<vmem>>, vector<1x32xf32>
    %37 = vector.broadcast %36 : vector<1x32xf32> to vector<16x32xf32>
    %38 = arith.addf %35, %37 : vector<16x32xf32>
    %c0_22 = arith.constant 0 : index
    %c0_23 = arith.constant 0 : index
    %39 = vector.load %arg8[%c0_22, %c0_23] : memref<16x32xf32, #tpu.memory_space<vmem>>, vector<16x32xf32>
    tpu.vector_store %arg8[%c0_22, %c0_23], %38 {strides = array<i32>} : memref<16x32xf32, #tpu.memory_space<vmem>>, vector<16x32xf32>,
    return
  }
  func.func @transform_0(%arg0: i32) -> (i32, i32) {
    %c0_i32 = arith.constant 0 : i32
    %c0_i32_0 = arith.constant 0 : i32
    return %arg0, %c0_i32 : i32, i32
  }
  func.func @transform_1(%arg0: i32) -> (i32, i32) {
    %c0_i32 = arith.constant 0 : i32
    %c0_i32_0 = arith.constant 0 : i32
    %c0_i32_1 = arith.constant 0 : i32
    return %c0_i32, %c0_i32_0 : i32, i32
  }
  func.func @transform_2(%arg0: i32) -> (i32, i32) {
    %c0_i32 = arith.constant 0 : i32
    %c0_i32_0 = arith.constant 0 : i32
    %c0_i32_1 = arith.constant 0 : i32
    return %c0_i32, %c0_i32_0 : i32, i32
  }
  func.func @transform_3(%arg0: i32) -> (i32, i32) {
    %c0_i32 = arith.constant 0 : i32
    %c0_i32_0 = arith.constant 0 : i32
    %c0_i32_1 = arith.constant 0 : i32
    return %c0_i32, %c0_i32_0 : i32, i32
  }
  func.func @transform_4(%arg0: i32) -> (i32, i32) {
    %c0_i32 = arith.constant 0 : i32
    %c0_i32_0 = arith.constant 0 : i32
    %c0_i32_1 = arith.constant 0 : i32
    return %c0_i32, %c0_i32_0 : i32, i32
  }
  func.func @transform_5(%arg0: i32) -> (i32, i32) {
    %c0_i32 = arith.constant 0 : i32
    %c0_i32_0 = arith.constant 0 : i32
    %c0_i32_1 = arith.constant 0 : i32
    return %c0_i32, %c0_i32_0 : i32, i32
  }
  func.func @transform_6(%arg0: i32) -> (i32, i32) {
    %c0_i32 = arith.constant 0 : i32
    %c0_i32_0 = arith.constant 0 : i32
    %c0_i32_1 = arith.constant 0 : i32
    return %c0_i32, %c0_i32_0 : i32, i32
  }
  func.func @transform_7(%arg0: i32) -> (i32, i32) {
    %c0_i32 = arith.constant 0 : i32
    %c0_i32_0 = arith.constant 0 : i32
    return %arg0, %c0_i32 : i32, i32
  }
}

module attributes {stable_mosaic.version = 11 : i64} {
  func.func @_ffn_add_ln_kernel(%arg0: i32, %arg1: memref<16x32xf32, #tpu.memory_space<vmem>>, %arg2: memref<32x64xf32, #tpu.memory_space<vmem>>, %arg3: memref<1x64xf32, #tpu.memory_space<vmem>>, %arg4: memref<64x32xf32, #tpu.memory_space<vmem>>, %arg5: memref<1x32xf32, #tpu.memory_space<vmem>>, %arg6: memref<1x32xf32, #tpu.memory_space<vmem>>, %arg7: memref<1x32xf32, #tpu.memory_space<vmem>>, %arg8: memref<16x32xf32, #tpu.memory_space<vmem>>) attributes {dimension_semantics = [#tpu.dimension_semantics<parallel>], iteration_bounds = array<i64: 1>, scalar_prefetch = 0 : i64, scratch_operands = 0 : i64, tpu.core_type = #tpu.core_type<tc>, window_params = [{transform_indices = @transform_0, window_bounds = array<i64: 16, 32>}, {pipeline_mode = #tpu.pipeline_mode<synchronous>, transform_indices = @transform_1, window_bounds = array<i64: 32, 64>}, {pipeline_mode = #tpu.pipeline_mode<synchronous>, transform_indices = @transform_2, window_bounds = array<i64: 1, 64>}, {pipeline_mode = #tpu.pipeline_mode<synchronous>, transform_indices = @transform_3, window_bounds = array<i64: 64, 32>}, {pipeline_mode = #tpu.pipeline_mode<synchronous>, transform_indices = @transform_4, window_bounds = array<i64: 1, 32>}, {pipeline_mode = #tpu.pipeline_mode<synchronous>, transform_indices = @transform_5, window_bounds = array<i64: 1, 32>}, {pipeline_mode = #tpu.pipeline_mode<synchronous>, transform_indices = @transform_6, window_bounds = array<i64: 1, 32>}, {transform_indices = @transform_7, window_bounds = array<i64: 16, 32>}]} {
    %c0 = arith.constant 0 : index
    %c0_0 = arith.constant 0 : index
    %0 = vector.load %arg1[%c0, %c0_0] : memref<16x32xf32, #tpu.memory_space<vmem>>, vector<16x32xf32>
    %c0_1 = arith.constant 0 : index
    %c0_2 = arith.constant 0 : index
    %1 = vector.load %arg1[%c0_1, %c0_2] : memref<16x32xf32, #tpu.memory_space<vmem>>, vector<16x32xf32>
    %c0_3 = arith.constant 0 : index
    %c0_4 = arith.constant 0 : index
    %2 = vector.load %arg2[%c0_3, %c0_4] : memref<32x64xf32, #tpu.memory_space<vmem>>, vector<32x64xf32>
    %cst = arith.constant dense<0.000000e+00> : vector<16x64xf32>
    %3 = tpu.matmul %1, %2, %cst {dimension_numbers = #tpu.dot_dimension_numbers<[1], [0], [0], [1], [0, 0, 1, 1], [], []>} : vector<16x32xf32>, vector<32x64xf32>, vector<16x64xf32> -> vector<16x64xf32>
    %c0_5 = arith.constant 0 : index
    %c0_6 = arith.constant 0 : index
    %4 = vector.load %arg3[%c0_5, %c0_6] : memref<1x64xf32, #tpu.memory_space<vmem>>, vector<1x64xf32>
    %5 = vector.broadcast %4 : vector<1x64xf32> to vector<16x64xf32>
    %6 = arith.addf %3, %5 : vector<16x64xf32>
    %cst_7 = arith.constant 0.000000e+00 : f32
    %7 = vector.broadcast %cst_7 : f32 to vector<16x64xf32>
    %8 = arith.maximumf %6, %7 : vector<16x64xf32>
    %c0_8 = arith.constant 0 : index
    %c0_9 = arith.constant 0 : index
    %9 = vector.load %arg4[%c0_8, %c0_9] : memref<64x32xf32, #tpu.memory_space<vmem>>, vector<64x32xf32>
    %cst_10 = arith.constant dense<0.000000e+00> : vector<16x32xf32>
    %10 = tpu.matmul %8, %9, %cst_10 {dimension_numbers = #tpu.dot_dimension_numbers<[1], [0], [0], [1], [0, 0, 1, 1], [], []>} : vector<16x64xf32>, vector<64x32xf32>, vector<16x32xf32> -> vector<16x32xf32>
    %c0_11 = arith.constant 0 : index
    %c0_12 = arith.constant 0 : index
    %11 = vector.load %arg5[%c0_11, %c0_12] : memref<1x32xf32, #tpu.memory_space<vmem>>, vector<1x32xf32>
    %12 = vector.broadcast %11 : vector<1x32xf32> to vector<16x32xf32>
    %13 = arith.addf %10, %12 : vector<16x32xf32>
    %14 = arith.addf %13, %0 : vector<16x32xf32>
    %cst_13 = arith.constant dense<0.000000e+00> : vector<16xf32>
    %15 = vector.multi_reduction <add>, %14, %cst_13 [1] : vector<16x32xf32> to vector<16xf32>
    %16 = vector.shape_cast %15 : vector<16xf32> to vector<16x1xf32>
    %cst_14 = arith.constant 3.200000e+01 : f32
    %17 = vector.broadcast %cst_14 : f32 to vector<16x1xf32>
    %18 = arith.divf %16, %17 : vector<16x1xf32>
    %19 = vector.broadcast %18 : vector<16x1xf32> to vector<16x32xf32>
    %20 = arith.subf %14, %19 : vector<16x32xf32>
    %21 = arith.mulf %20, %20 : vector<16x32xf32>
    %cst_15 = arith.constant dense<0.000000e+00> : vector<16xf32>
    %22 = vector.multi_reduction <add>, %21, %cst_15 [1] : vector<16x32xf32> to vector<16xf32>
    %23 = vector.shape_cast %22 : vector<16xf32> to vector<16x1xf32>
    %cst_16 = arith.constant 3.200000e+01 : f32
    %24 = vector.broadcast %cst_16 : f32 to vector<16x1xf32>
    %25 = arith.divf %23, %24 : vector<16x1xf32>
    %26 = vector.broadcast %18 : vector<16x1xf32> to vector<16x32xf32>
    %27 = arith.subf %14, %26 : vector<16x32xf32>
    %cst_17 = arith.constant 9.99999997E-7 : f32
    %28 = vector.broadcast %cst_17 : f32 to vector<16x1xf32>
    %29 = arith.addf %25, %28 : vector<16x1xf32>
    %30 = math.rsqrt %29 : vector<16x1xf32>
    %31 = vector.broadcast %30 : vector<16x1xf32> to vector<16x32xf32>
    %32 = arith.mulf %27, %31 : vector<16x32xf32>
    %c0_18 = arith.constant 0 : index
    %c0_19 = arith.constant 0 : index
    %33 = vector.load %arg6[%c0_18, %c0_19] : memref<1x32xf32, #tpu.memory_space<vmem>>, vector<1x32xf32>
    %34 = vector.broadcast %33 : vector<1x32xf32> to vector<16x32xf32>
    %35 = arith.mulf %32, %34 : vector<16x32xf32>
    %c0_20 = arith.constant 0 : index
    %c0_21 = arith.constant 0 : index
    %36 = vector.load %arg7[%c0_20, %c0_21] : memref<1x32xf32, #tpu.memory_space<vmem>>, vector<1x32xf32>
    %37 = vector.broadcast %36 : vector<1x32xf32> to vector<16x32xf32>
    %38 = arith.addf %35, %37 : vector<16x32xf32>
    %c0_22 = arith.constant 0 : index
    %c0_23 = arith.constant 0 : index
    %39 = vector.load %arg8[%c0_22, %c0_23] : memref<16x32xf32, #tpu.memory_space<vmem>>, vector<16x32xf32>
    tpu.vector_store %arg8[%c0_22, %c0_23], %38 {strides = array<i32>} : memref<16x32xf32, #tpu.memory_space<vmem>>, vector<16x32xf32>,
    return
  }
  func.func @transform_0(%arg0: i32) -> (i32, i32) {
    %c0_i32 = arith.constant 0 : i32
    %c0_i32_0 = arith.constant 0 : i32
    return %arg0, %c0_i32 : i32, i32
  }
  func.func @transform_1(%arg0: i32) -> (i32, i32) {
    %c0_i32 = arith.constant 0 : i32
    %c0_i32_0 = arith.constant 0 : i32
    %c0_i32_1 = arith.constant 0 : i32
    return %c0_i32, %c0_i32_0 : i32, i32
  }
  func.func @transform_2(%arg0: i32) -> (i32, i32) {
    %c0_i32 = arith.constant 0 : i32
    %c0_i32_0 = arith.constant 0 : i32
    %c0_i32_1 = arith.constant 0 : i32
    return %c0_i32, %c0_i32_0 : i32, i32
  }
  func.func @transform_3(%arg0: i32) -> (i32, i32) {
    %c0_i32 = arith.constant 0 : i32
    %c0_i32_0 = arith.constant 0 : i32
    %c0_i32_1 = arith.constant 0 : i32
    return %c0_i32, %c0_i32_0 : i32, i32
  }
  func.func @transform_4(%arg0: i32) -> (i32, i32) {
    %c0_i32 = arith.constant 0 : i32
    %c0_i32_0 = arith.constant 0 : i32
    %c0_i32_1 = arith.constant 0 : i32
    return %c0_i32, %c0_i32_0 : i32, i32
  }
  func.func @transform_5(%arg0: i32) -> (i32, i32) {
    %c0_i32 = arith.constant 0 : i32
    %c0_i32_0 = arith.constant 0 : i32
    %c0_i32_1 = arith.constant 0 : i32
    return %c0_i32, %c0_i32_0 : i32, i32
  }
  func.func @transform_6(%arg0: i32) -> (i32, i32) {
    %c0_i32 = arith.constant 0 : i32
    %c0_i32_0 = arith.constant 0 : i32
    %c0_i32_1 = arith.constant 0 : i32
    return %c0_i32, %c0_i32_0 : i32, i32
  }
  func.func @transform_7(%arg0: i32) -> (i32, i32) {
    %c0_i32 = arith.constant 0 : i32
    %c0_i32_0 = arith.constant 0 : i32
    return %arg0, %c0_i32 : i32, i32
  }
}

</mosaic_0001>

<bundles_post_ra>
// kernel: decoder_forward.17
= control target key start
LH: loop header
LB: loop body
LE: loop exit
PB: predicated region body
PF: predicated region fallthrough
CT: control target
= control target key end

     0   :  { %s335_s15 = smov 0   ;;  %s364_s0 = inlined_call_operand.vmem [shape: f32[2,8,32], index: 0, kind: input, shape index: {}]   ;;  %s365_s1 = inlined_call_operand.vmem [shape: f32[8,32], index: 1, kind: input, shape index: {}]   ;;  %s366_s2 = inlined_call_operand.vmem [shape: f32[1,32], index: 2, kind: input, shape index: {}]   ;;  %s367_s3 = inlined_call_operand.vmem [shape: f32[1,32], index: 3, kind: input, shape index: {}]   ;;  %s368_s4 = inlined_call_operand.vmem [shape: f32[2,8,32], index: 4, kind: output, shape index: {}]  }
   0x1 LB: > { %s281_s16 = sadd.s32 4294967295, %s308_s15   ;;  %p285_p0 = scmp.ge.s32.totalorder %s308_s15, 1  ;;  %s308_s15 = sphi %s335_s15, %s14_s15  }
   0x2   : > { %p161_p1 = scmp.lt.s32.totalorder %s308_s15, 3 }
   0x4   : > { %p162_p2 = pnand %p285_p0, %p161_p1 }
   0x5   : > { %p185_p3 = scmp.lt.s32.totalorder (!%p162_p2), %s281_s16, 1  ;;  %v194_v0 = vld [vmem:[%s365_s1] sm:$0xff] (!%p162_p2)  ;;  %vm196_vm0 = vcmask (!%p162_p2), 261120  }
   0x6   : > { %165 = sbr.rel (%p162_p2) target bundleno = 333 (0x14d), region = 36  ;;  %v288_v13 = vld [vmem:[%s366_s2] ss:$0 sm:$0xff] (!%p162_p2) }
   0x7   : > { %v289_v15 = vld [vmem:[%s367_s3] ss:$0 sm:$0xff] (!%p162_p2) }
   0xd   : > { %s370_s16 = smov (!%p185_p3, %s281_s16), 1 }
   0xe   : > { %s286_s17 = sshll.u32 %s370_s16, 3 }
   0xf   : > { %s188_s22 = scalar_lea.vmem %s364_s0, %s286_s17  ;;  %s192_s29 = scalar_lea.vmem %s368_s4, %s286_s17 }
  0x10   : > { %v193_v1 = vld [vmem:[%s188_s22] sm:$0xff] }
  0x11   : > { %v195_v2 = vadd.f32 %v194_v0, %v193_v1 }
  0x13   : > { %v197_v3 = vsel %vm196_vm0, %v195_v2, 0.0 }
  0x14   : > { %198 = vadd.xlane.f32.xlu0 %v197_v3 }
  0xa1   : > { %v199_v4 = vpop.xlane.xlu0 %198 }
  0xa2   : > { %v201_v5 = vmul.f32 0.03125, %v199_v4 }
  0xa4   : > { %v202_v6 = vsub.f32 %v195_v2, %v201_v5 }
  0xa6   : > { %v203_v7 = vmul.f32 %v202_v6, %v202_v6 }
  0xa8   : > { %v204_v8 = vsel %vm196_vm0, %v203_v7, 0.0 }
  0xa9   : > { %205 = vadd.xlane.f32.xlu0 %v204_v8 }
 0x136   : > { %v206_v9 = vpop.xlane.xlu0 %205 }
 0x137   : > { %v207_v10 = vmul.f32 0.03125, %v206_v9 }
 0x139   : > { %v208_v11 = vadd.f32 1e-09, %v207_v10 }
 0x13b   : > { %300 = vrsqrt.f32 %v208_v11 }
 0x145   : > { %v301_v12 = vpop.eup %300 }
 0x146   : > { %v210_v14 = vmul.f32 %v301_v12, %v202_v6 }
 0x148   : > { %v218_v16 = vmul.f32 %v288_v13, %v210_v14 }
 0x14a   : > { %v226_v17 = vadd.f32 %v289_v15, %v218_v16 }
 0x14c   : > { %227 = vst.msk [vmem:[%s192_s29] sm:$0xff] %vm196_vm0, %v226_v17 }
 0x14d PF: > { %s14_s15 = sadd.s32 1, %s308_s15  }
 0x14e   : > { %p11_p4 = scmp.ge.s32.totalorder %s14_s15, 4  }
 0x150   :  { %13 = sbr.rel (!%p11_p4) target bundleno = 1 (0x1), region = 66 }

// kernel: decoder_forward.20
= control target key start
LH: loop header
LB: loop body
LE: loop exit
PB: predicated region body
PF: predicated region fallthrough
CT: control target
= control target key end

     0   :  { %vm36_vm0 = vcmask 261120   ;;  %s289_s1 = inlined_call_operand.vmem [shape: f32[32,32], index: 1, kind: input, shape index: {}]   ;;  %s290_s0 = inlined_call_operand.vmem [shape: f32[16,32], index: 0, kind: input, shape index: {}]   ;;  %s291_s2 = inlined_call_operand.vmem [shape: f32[1,32], index: 2, kind: input, shape index: {}]   ;;  %s292_s3 = inlined_call_operand.vmem [shape: f32[16,32], index: 3, kind: input, shape index: {}]   ;;  %s293_s4 = inlined_call_operand.vmem [shape: f32[1,32], index: 4, kind: input, shape index: {}]   ;;  %s294_s5 = inlined_call_operand.vmem [shape: f32[1,32], index: 5, kind: input, shape index: {}]   ;;  %s295_s6 = inlined_call_operand.vmem [shape: f32[16,32], index: 6, kind: output, shape index: {}]  }
   0x1   :  { %v25_v0 = vld [vmem:[%s289_s1] sm:$0xff]  ;;  %v26_v1 = vld [vmem:[%s289_s1 + $0x8] sm:$0xff]  ;;  %v27_v2 = vld [vmem:[%s289_s1 + $0x10] sm:$0xff] }
   0x2   :  { %v195_v3 = vpack.c.bf16 %v26_v1, %v25_v0  ;;  %v28_v4 = vld [vmem:[%s289_s1 + $0x18] sm:$0xff]  ;;  %v23_v5 = vld [vmem:[%s290_s0] sm:$0xff]  ;;  %v24_v7 = vld [vmem:[%s290_s0 + $0x8] sm:$0xff] }
   0x3   :  { %v199_v6 = vpack.c.bf16 %v28_v4, %v27_v2  ;;  %192 = vmatprep.mubr.msk.f32.mxu0 %vm36_vm0, %v23_v5  ;;  %v173_v8 = vld [vmem:[%s291_s2] ss:$0 sm:$0xff]  ;;  %v119_v14 = vld [vmem:[%s292_s3 + $0x8] sm:$0xff] }
   0x4   :  { %196 = vmatprep.subr.bf16.mxu0 %v195_v3  ;;  %v118_v11 = vld [vmem:[%s292_s3] sm:$0xff] }
   0x5   :  { %198 = vmatpush3.bf16.msra.mxu0 %v195_v3  ;;  %v176_v36 = vld [vmem:[%s293_s4] ss:$0 sm:$0xff] }
   0x6   :  { %200 = vmatprep.subr.bf16.mxu0 %v199_v6  ;;  %v177_v38 = vld [vmem:[%s294_s5] ss:$0 sm:$0xff] }
   0x9   :  { %202 = vmatpush3.bf16.msra.mxu0 %v199_v6 }
   0xc   :  { %193 = vmatmul.mubr.msk.f32.vlgmr.msra.gmra.mrb[0].mxu0 %vm36_vm0, %v24_v7 }
  0xdf   :  { %v194_v9 = vpop.f32.mrb[0].mxu0 }
  0xe0   :  { %v109_v10 = vpop.f32.mrb[1].mxu0  ;;  %v115_v12 = vadd.f32 %v194_v9, %v173_v8 }
  0xe1   :  { %v110_v13 = vadd.f32 %v173_v8, %v109_v10 }
  0xe2   :  { %v121_v17 = vadd.f32 %v119_v14, %v115_v12 }
  0xe3   :  { %v120_v15 = vadd.f32 %v118_v11, %v110_v13 }
  0xe4   :  { %v125_v18 = vsel %vm36_vm0, %v121_v17, 0.0 }
  0xe5   :  { %v122_v16 = vsel %vm36_vm0, %v120_v15, 0.0 }
  0xe6   :  { %123 = vadd.xlane.f32.xlu0 %v122_v16 }
  0xea   :  { %126 = vadd.xlane.f32.xlu0 %v125_v18 }
 0x173   :  { %v124_v19 = vpop.xlane.xlu0 %123 }
 0x174   :  { %v129_v20 = vmul.f32 0.03125, %v124_v19 }
 0x176   :  { %v131_v21 = vsub.f32 %v120_v15, %v129_v20 }
 0x177   :  { %v127_v22 = vpop.xlane.xlu0 %126 }
 0x178   :  { %v130_v23 = vmul.f32 0.03125, %v127_v22  ;;  %v133_v24 = vmul.f32 %v131_v21, %v131_v21 }
 0x17a   :  { %v132_v25 = vsub.f32 %v121_v17, %v130_v23  ;;  %v135_v26 = vsel %vm36_vm0, %v133_v24, 0.0 }
 0x17b   :  { %136 = vadd.xlane.f32.xlu1 %v135_v26 }
 0x17c   :  { %v134_v27 = vmul.f32 %v132_v25, %v132_v25 }
 0x17e   :  { %v138_v28 = vsel %vm36_vm0, %v134_v27, 0.0 }
 0x17f   :  { %139 = vadd.xlane.f32.xlu1 %v138_v28 }
 0x208   :  { %v137_v29 = vpop.xlane.xlu1 %136 }
 0x209   :  { %v141_v30 = vmul.f32 0.03125, %v137_v29 }
 0x20b   :  { %v143_v31 = vadd.f32 1e-06, %v141_v30 }
 0x20c   :  { %v140_v32 = vpop.xlane.xlu1 %139 }
 0x20d   :  { %203 = vrsqrt.f32 %v143_v31  ;;  %v142_v33 = vmul.f32 0.03125, %v140_v32 }
 0x20f   :  { %v144_v34 = vadd.f32 1e-06, %v142_v33 }
 0x211   :  { %205 = vrsqrt.f32 %v144_v34 }
 0x217   :  { %v204_v35 = vpop.eup %203 }
 0x218   :  { %v147_v37 = vmul.f32 %v204_v35, %v131_v21 }
 0x21a   :  { %v156_v39 = vmul.f32 %v176_v36, %v147_v37 }
 0x21b   :  { %v206_v40 = vpop.eup %205 }
 0x21c   :  { %v165_v41 = vadd.f32 %v177_v38, %v156_v39  ;;  %v148_v42 = vmul.f32 %v206_v40, %v132_v25 }
 0x21e   :  { %167 = vst.msk [vmem:[%s295_s6] sm:$0xff] %vm36_vm0, %v165_v41  ;;  %v157_v43 = vmul.f32 %v176_v36, %v148_v42 }
 0x220   :  { %v166_v44 = vadd.f32 %v177_v38, %v157_v43 }
 0x222   :  { %168 = vst.msk [vmem:[%s295_s6 + $0x8] sm:$0xff] %vm36_vm0, %v166_v44 }

// kernel: decoder_forward.18
= control target key start
LH: loop header
LB: loop body
LE: loop exit
PB: predicated region body
PF: predicated region fallthrough
CT: control target
= control target key end

     0   :  { %vm29_vm0 = vcmask 261120   ;;  %vm18_vm1 = vcmask 785408   ;;  %v165_v3 = vmov 0.0   ;;  %s221_s1 = inlined_call_operand.vmem [shape: f32[32,96], index: 1, kind: input, shape index: {}]   ;;  %s222_s0 = inlined_call_operand.vmem [shape: f32[16,32], index: 0, kind: input, shape index: {}]   ;;  %s223_s2 = inlined_call_operand.vmem [shape: f32[1,96], index: 2, kind: input, shape index: {}]   ;;  %s224_s3 = inlined_call_operand.vmem [shape: f32[16,96], index: 3, kind: output, shape index: {}]  }
   0x1   :  { %v25_v0 = vld [vmem:[%s221_s1] sm:$0xff]  ;;  %v26_v1 = vld [vmem:[%s221_s1 + $0x8] sm:$0xff]  ;;  %v27_v2 = vld [vmem:[%s221_s1 + $0x10] sm:$0xff]  ;;  %20 = vst.msk [vmem:[#allocation2 + $0x8] sm:$0xff] %vm18_vm1, %v165_v3 }
   0x2   :  { %19 = vst.msk [vmem:[#allocation2] sm:$0xff] %vm18_vm1, %v165_v3  ;;  %v156_v4 = vpack.c.bf16 %v26_v1, %v25_v0  ;;  %v28_v5 = vld [vmem:[%s221_s1 + $0x18] sm:$0xff]  ;;  %v23_v6 = vld [vmem:[%s222_s0] sm:$0xff]  ;;  %v24_v8 = vld [vmem:[%s222_s0 + $0x8] sm:$0xff] }
   0x3   :  { %v160_v7 = vpack.c.bf16 %v28_v5, %v27_v2  ;;  %153 = vmatprep.mubr.msk.f32.mxu0 %vm29_vm0, %v23_v6  ;;  %v138_v15 = vld [vmem:[%s223_s2] ss:$0 sm:$0xff] }
   0x4   :  { %157 = vmatprep.subr.bf16.mxu0 %v156_v4 }
   0x5   :  { %159 = vmatpush3.bf16.msra.mxu0 %v156_v4 }
   0x6   :  { %161 = vmatprep.subr.bf16.mxu0 %v160_v7 }
   0x8   :  { %v22_v9 = vld [vmem:[#allocation2 + $0x8] sm:$0xff] }
   0x9   :  { %163 = vmatpush3.bf16.msra.mxu0 %v160_v7  ;;  %v21_v10 = vld [vmem:[#allocation2] sm:$0xff] }
   0xc   :  { %154 = vmatmul.mubr.msk.f32.vlgmr.msra.gmra.mrb[0].mxu0 %vm29_vm0, %v24_v8 }
  0xdf   :  { %v155_v11 = vpop.f32.mrb[0].mxu0 }
  0xe0   :  { %v112_v12 = vadd.f32 %v155_v11, %v22_v9  ;;  %v102_v13 = vpop.f32.mrb[1].mxu0 }
  0xe1   :  { %v111_v14 = vadd.f32 %v102_v13, %v21_v10 }
  0xe2   :  { %115 = vst.msk [vmem:[#allocation2 + $0x8] sm:$0xff] %vm18_vm1, %v112_v12 }
  0xe3   :  { %114 = vst.msk [vmem:[#allocation2] sm:$0xff] %vm18_vm1, %v111_v14 }
  0xe9   :  { %v120_v16 = vld [vmem:[#allocation2 + $0x8] sm:$0xff] }
  0xea   :  { %v129_v17 = vadd.f32 %v138_v15, %v120_v16  ;;  %v119_v18 = vld [vmem:[#allocation2] sm:$0xff] }
  0xeb   :  { %v128_v19 = vadd.f32 %v138_v15, %v119_v18 }
  0xec   :  { %131 = vst.msk [vmem:[%s224_s3 + $0x8] sm:$0xff] %vm18_vm1, %v129_v17 }
  0xed   :  { %130 = vst.msk [vmem:[%s224_s3] sm:$0xff] %vm18_vm1, %v128_v19 }

// kernel: decoder_forward.19
= control target key start
LH: loop header
LB: loop body
LE: loop exit
PB: predicated region body
PF: predicated region fallthrough
CT: control target
= control target key end

     0   :  { %s713_s12 = smov 0   ;;  %s757_s0 = inlined_call_operand.vmem [shape: f32[2,8,32], index: 0, kind: input, shape index: {}]   ;;  %s758_s1 = inlined_call_operand.vmem [shape: f32[2,8,32], index: 1, kind: input, shape index: {}]   ;;  %s759_s2 = inlined_call_operand.vmem [shape: f32[2,8,32], index: 2, kind: input, shape index: {}]   ;;  %s760_s3 = inlined_call_operand.vmem [shape: f32[2,8,32], index: 3, kind: output, shape index: {}]  }
   0x1 LB: > { %s616_s13 = sadd.s32 4294967295, %s687_s12   ;;  %p620_p0 = scmp.ge.s32.totalorder %s687_s12, 1  ;;  %s687_s12 = sphi %s713_s12, %s13_s12  }
   0x2   : > { %p154_p1 = scmp.lt.s32.totalorder %s687_s12, 3 }
   0x4   : > { %p155_p2 = pnand %p620_p0, %p154_p1 }
   0x5   : > { %p184_p3 = scmp.lt.s32.totalorder (!%p155_p2), %s616_s13, 1  ;;  %v689_v0 = vmov (!%p155_p2), 0.0   ;;  %vm690_vm0 = vmmov (!%p155_p2), 0   ;;  %vm204_vm1 = vcmask (!%p155_p2), 130048   ;;  %vm281_vm2 = vcmask (!%p155_p2), 64512   ;;  %s691_s21 = smov (!%p155_p2), 112  }
   0x6   : > { %158 = sbr.rel (%p155_p2) target bundleno = 1405 (0x57d), region = 32  ;;  %641 = vmatprep.subr.mxu0 (!%p155_p2), %v689_v0  ;;  %643 = vmatprep.mubr.msk.f32.mxu0 (!%p155_p2), %vm690_vm0, %v689_v0  ;;  %s692_s25 = smov (!%p155_p2), 16   ;;  %vm537_vm3 = vcmask (!%p155_p2), 261120  }
   0x7   : > { %646 = vmatprep.subr.mxu1 (!%p155_p2), %v689_v0  ;;  %648 = vmatprep.mubr.msk.f32.mxu1 (!%p155_p2), %vm690_vm0, %v689_v0 }
   0xd   : > { %s762_s13 = smov (!%p184_p3, %s616_s13), 1 }
   0xe   : > { %s723_s14 = sshll.u32 %s762_s13, 3 }
   0xf   : > { %s191_s17 = scalar_lea.vmem %s758_s1, %s723_s14  ;;  %s187_s20 = scalar_lea.vmem %s757_s0, %s723_s14 }
  0x10   : > { %v202_v1 = vld [vmem:[%s191_s17] sm:$0xff]  ;;  %s195_s24 = scalar_lea.vmem %s759_s2, %s723_s14  ;;  %s199_s28 = scalar_lea.vmem %s760_s3, %s723_s14 }
  0x11   : > { %v200_v2 = vld [vmem:[%s187_s20] sm:$0xff]  ;;  %642 = vmatpush3.xpose.msk.msra.mxu0 %vm204_vm1, %v202_v1  ;;  %368 = vrot.lane.b32.xlu1 %v202_v1, %s691_s21 }
  0x12   : > { %v201_v3 = vmul.f32 0.25, %v200_v2  ;;  %656 = vmatprep.subr.mxu0 %v689_v0  ;;  %v203_v12 = vld [vmem:[%s195_s24] sm:$0xff] }
  0x13   : > { %647 = vmatpush3.msra.mxu1 %v203_v12 }
  0x14   : > { %644 = vmatmul.mubr.msk.f32.vlgmr.msra.gmra.mrb[0].mxu0 %vm204_vm1, %v201_v3  ;;  %651 = vmatprep.subr.mxu1 %v689_v0 }
  0x15   : > { %658 = vmatprep.mubr.msk.f32.mxu0 %vm690_vm0, %v689_v0  ;;  %366 = vrot.lane.b32.xlu1 %v201_v3, %s691_s21 }
  0x83   : > { %v369_v14 = vpop.permute.xlu1 %368 }
  0x87   : > { %v367_v17 = vpop.permute.xlu1 %366 }
  0xe7   : > { %v277_v4 = vpop.f32.mrb[0].mxu0 }
  0xe8   : > { %v645_v5 = vpop.f32.mrb[1].mxu0  ;;  %v282_v6 = vsel %vm281_vm2, %v277_v4, -inf }
  0xe9   : > { %283 = vmax.xlane.f32.xlu0 %v282_v6 }
 0x176   : > { %v284_v7 = vpop.xlane.xlu0 %283 }
 0x177   : > { %v285_v8 = vsub.f32 %v277_v4, %v284_v7 }
 0x179   : > { %v286_v9 = vmul.f32 1.442695, %v285_v8 }
 0x17b   : > { %673 = vpow2.f32 %v286_v9 }
 0x185   : > { %v674_v10 = vpop.eup %673 }
 0x186   : > { %v288_v11 = vsel %vm281_vm2, %v674_v10, 0.0 }
 0x187   : > { %289 = vadd.xlane.f32.xlu0 %v288_v11 }
 0x214   : > { %v290_v13 = vpop.xlane.xlu0 %289 }
 0x215   : > { %675 = vrcp.f32 %v290_v13 }
 0x21f   : > { %v676_v15 = vpop.eup %675 }
 0x220   : > { %v292_v16 = vmul.f32 %v676_v15, %v674_v10 }
 0x222   : > { %649 = vmatmul.mubr.msk.f32.vlgmr.msra.gmra.mrb[0].mxu1 %vm281_vm2, %v292_v16 }
 0x223   : > { %652 = vmatpush3.xpose.msk.msra.mxu1 %vm204_vm1, %v369_v14  ;;  %653 = vmatprep.mubr.msk.f32.mxu1 %vm690_vm0, %v689_v0 }
 0x226   : > { %654 = vmatmul.mubr.msk.f32.vlgmr.msra.gmra.mrb[2].mxu1 %vm204_vm1, %v367_v17 }
 0x2f5   : > { %v362_v18 = vpop.f32.mrb[0].mxu1 }
 0x2f6   : > { %v650_v19 = vpop.f32.mrb[1].mxu1 }
 0x2f9   : > { %v440_v20 = vpop.f32.mrb[2].mxu1 }
 0x2fa   : > { %v655_v21 = vpop.f32.mrb[3].mxu1  ;;  %v444_v22 = vsel %vm281_vm2, %v440_v20, -inf }
 0x2fb   : > { %445 = vmax.xlane.f32.xlu0 %v444_v22 }
 0x311   : > { %456 = vrot.lane.b32.xlu0 %v203_v12, %s691_s21 }
 0x388   : > { %v446_v23 = vpop.xlane.xlu0 %445 }
 0x389   : > { %v447_v24 = vsub.f32 %v440_v20, %v446_v23 }
 0x38b   : > { %v448_v25 = vmul.f32 1.442695, %v447_v24 }
 0x38c   : > { %v457_v28 = vpop.permute.xlu0 %456 }
 0x38d   : > { %677 = vpow2.f32 %v448_v25  ;;  %657 = vmatpush3.msra.mxu0 %v457_v28 }
 0x397   : > { %v678_v26 = vpop.eup %677 }
 0x398   : > { %v450_v27 = vsel %vm281_vm2, %v678_v26, 0.0 }
 0x399   : > { %451 = vadd.xlane.f32.xlu1 %v450_v27 }
 0x426   : > { %v452_v29 = vpop.xlane.xlu1 %451 }
 0x427   : > { %679 = vrcp.f32 %v452_v29 }
 0x431   : > { %v680_v30 = vpop.eup %679 }
 0x432   : > { %v454_v31 = vmul.f32 %v680_v30, %v678_v26 }
 0x434   : > { %659 = vmatmul.mubr.msk.f32.vlgmr.msra.gmra.mrb[2].mxu0 %vm281_vm2, %v454_v31 }
 0x507   : > { %v528_v32 = vpop.f32.mrb[2].mxu0 }
 0x508   : > { %533 = vrot.lane.b32.xlu0 %v528_v32, %s692_s25  ;;  %v660_v33 = vpop.f32.mrb[3].mxu0 }
 0x57a   : > { %v534_v34 = vpop.permute.xlu0 %533 }
 0x57b   : > { %v536_v35 = vsel %vm204_vm1, %v362_v18, %v534_v34 }
 0x57c   : > { %538 = vst.msk [vmem:[%s199_s28] sm:$0xff] %vm537_vm3, %v536_v35 }
 0x57d PF: > { %s13_s12 = sadd.s32 1, %s687_s12  }
 0x57e   : > { %p10_p4 = scmp.ge.s32.totalorder %s13_s12, 4  }
 0x580   :  { %12 = sbr.rel (!%p10_p4) target bundleno = 1 (0x1), region = 68 }

// kernel: decoder_forward.22
= control target key start
LH: loop header
LB: loop body
LE: loop exit
PB: predicated region body
PF: predicated region fallthrough
CT: control target
= control target key end

     0   :  { %vm29_vm0 = vcmask 261120   ;;  %vm18_vm1 = vcmask 523264   ;;  %v165_v3 = vmov 0.0   ;;  %s221_s1 = inlined_call_operand.vmem [shape: f32[32,64], index: 1, kind: input, shape index: {}]   ;;  %s222_s0 = inlined_call_operand.vmem [shape: f32[16,32], index: 0, kind: input, shape index: {}]   ;;  %s223_s2 = inlined_call_operand.vmem [shape: f32[1,64], index: 2, kind: input, shape index: {}]   ;;  %s224_s3 = inlined_call_operand.vmem [shape: f32[16,64], index: 3, kind: output, shape index: {}]  }
   0x1   :  { %v25_v0 = vld [vmem:[%s221_s1] sm:$0xff]  ;;  %v26_v1 = vld [vmem:[%s221_s1 + $0x8] sm:$0xff]  ;;  %v27_v2 = vld [vmem:[%s221_s1 + $0x10] sm:$0xff]  ;;  %20 = vst.msk [vmem:[#allocation2 + $0x8] sm:$0xff] %vm18_vm1, %v165_v3 }
   0x2   :  { %19 = vst.msk [vmem:[#allocation2] sm:$0xff] %vm18_vm1, %v165_v3  ;;  %v156_v4 = vpack.c.bf16 %v26_v1, %v25_v0  ;;  %v28_v5 = vld [vmem:[%s221_s1 + $0x18] sm:$0xff]  ;;  %v23_v6 = vld [vmem:[%s222_s0] sm:$0xff]  ;;  %v24_v8 = vld [vmem:[%s222_s0 + $0x8] sm:$0xff] }
   0x3   :  { %v160_v7 = vpack.c.bf16 %v28_v5, %v27_v2  ;;  %153 = vmatprep.mubr.msk.f32.mxu0 %vm29_vm0, %v23_v6  ;;  %v138_v15 = vld [vmem:[%s223_s2] ss:$0 sm:$0xff] }
   0x4   :  { %157 = vmatprep.subr.bf16.mxu0 %v156_v4 }
   0x5   :  { %159 = vmatpush3.bf16.msra.mxu0 %v156_v4 }
   0x6   :  { %161 = vmatprep.subr.bf16.mxu0 %v160_v7 }
   0x8   :  { %v22_v9 = vld [vmem:[#allocation2 + $0x8] sm:$0xff] }
   0x9   :  { %163 = vmatpush3.bf16.msra.mxu0 %v160_v7  ;;  %v21_v10 = vld [vmem:[#allocation2] sm:$0xff] }
   0xc   :  { %154 = vmatmul.mubr.msk.f32.vlgmr.msra.gmra.mrb[0].mxu0 %vm29_vm0, %v24_v8 }
  0xdf   :  { %v155_v11 = vpop.f32.mrb[0].mxu0 }
  0xe0   :  { %v112_v12 = vadd.f32 %v155_v11, %v22_v9  ;;  %v102_v13 = vpop.f32.mrb[1].mxu0 }
  0xe1   :  { %v111_v14 = vadd.f32 %v102_v13, %v21_v10 }
  0xe2   :  { %115 = vst.msk [vmem:[#allocation2 + $0x8] sm:$0xff] %vm18_vm1, %v112_v12 }
  0xe3   :  { %114 = vst.msk [vmem:[#allocation2] sm:$0xff] %vm18_vm1, %v111_v14 }
  0xe9   :  { %v120_v16 = vld [vmem:[#allocation2 + $0x8] sm:$0xff] }
  0xea   :  { %v129_v17 = vadd.f32 %v138_v15, %v120_v16  ;;  %v119_v18 = vld [vmem:[#allocation2] sm:$0xff] }
  0xeb   :  { %v128_v19 = vadd.f32 %v138_v15, %v119_v18 }
  0xec   :  { %131 = vst.msk [vmem:[%s224_s3 + $0x8] sm:$0xff] %vm18_vm1, %v129_v17 }
  0xed   :  { %130 = vst.msk [vmem:[%s224_s3] sm:$0xff] %vm18_vm1, %v128_v19 }

// kernel: decoder_forward.21
= control target key start
LH: loop header
LB: loop body
LE: loop exit
PB: predicated region body
PF: predicated region fallthrough
CT: control target
= control target key end

     0   :  { %vm18_vm0 = vcmask 261120   ;;  %v164_v3 = vmov 0.0   ;;  %s220_s1 = inlined_call_operand.vmem [shape: f32[32,32], index: 1, kind: input, shape index: {}]   ;;  %s221_s0 = inlined_call_operand.vmem [shape: f32[16,32], index: 0, kind: input, shape index: {}]   ;;  %s222_s2 = inlined_call_operand.vmem [shape: f32[1,32], index: 2, kind: input, shape index: {}]   ;;  %s223_s3 = inlined_call_operand.vmem [shape: f32[16,32], index: 3, kind: output, shape index: {}]  }
   0x1   :  { %v25_v0 = vld [vmem:[%s220_s1] sm:$0xff]  ;;  %v26_v1 = vld [vmem:[%s220_s1 + $0x8] sm:$0xff]  ;;  %v27_v2 = vld [vmem:[%s220_s1 + $0x10] sm:$0xff]  ;;  %20 = vst.msk [vmem:[#allocation2 + $0x8] sm:$0xff] %vm18_vm0, %v164_v3 }
   0x2   :  { %19 = vst.msk [vmem:[#allocation2] sm:$0xff] %vm18_vm0, %v164_v3  ;;  %v155_v4 = vpack.c.bf16 %v26_v1, %v25_v0  ;;  %v28_v5 = vld [vmem:[%s220_s1 + $0x18] sm:$0xff]  ;;  %v23_v6 = vld [vmem:[%s221_s0] sm:$0xff]  ;;  %v24_v8 = vld [vmem:[%s221_s0 + $0x8] sm:$0xff] }
   0x3   :  { %v159_v7 = vpack.c.bf16 %v28_v5, %v27_v2  ;;  %152 = vmatprep.mubr.msk.f32.mxu0 %vm18_vm0, %v23_v6  ;;  %v137_v15 = vld [vmem:[%s222_s2] ss:$0 sm:$0xff] }
   0x4   :  { %156 = vmatprep.subr.bf16.mxu0 %v155_v4 }
   0x5   :  { %158 = vmatpush3.bf16.msra.mxu0 %v155_v4 }
   0x6   :  { %160 = vmatprep.subr.bf16.mxu0 %v159_v7 }
   0x8   :  { %v22_v9 = vld [vmem:[#allocation2 + $0x8] sm:$0xff] }
   0x9   :  { %162 = vmatpush3.bf16.msra.mxu0 %v159_v7  ;;  %v21_v10 = vld [vmem:[#allocation2] sm:$0xff] }
   0xc   :  { %153 = vmatmul.mubr.msk.f32.vlgmr.msra.gmra.mrb[0].mxu0 %vm18_vm0, %v24_v8 }
  0xdf   :  { %v154_v11 = vpop.f32.mrb[0].mxu0 }
  0xe0   :  { %v112_v12 = vadd.f32 %v154_v11, %v22_v9  ;;  %v102_v13 = vpop.f32.mrb[1].mxu0 }
  0xe1   :  { %v111_v14 = vadd.f32 %v102_v13, %v21_v10 }
  0xe2   :  { %114 = vst.msk [vmem:[#allocation2 + $0x8] sm:$0xff] %vm18_vm0, %v112_v12 }
  0xe3   :  { %113 = vst.msk [vmem:[#allocation2] sm:$0xff] %vm18_vm0, %v111_v14 }
  0xe9   :  { %v119_v16 = vld [vmem:[#allocation2 + $0x8] sm:$0xff] }
  0xea   :  { %v128_v17 = vadd.f32 %v137_v15, %v119_v16  ;;  %v118_v18 = vld [vmem:[#allocation2] sm:$0xff] }
  0xeb   :  { %v127_v19 = vadd.f32 %v137_v15, %v118_v18 }
  0xec   :  { %130 = vst.msk [vmem:[%s223_s3 + $0x8] sm:$0xff] %vm18_vm0, %v128_v17 }
  0xed   :  { %129 = vst.msk [vmem:[%s223_s3] sm:$0xff] %vm18_vm0, %v127_v19 }

// kernel: decoder_forward.25
= control target key start
LH: loop header
LB: loop body
LE: loop exit
PB: predicated region body
PF: predicated region fallthrough
CT: control target
= control target key end

     0   :  { %vm39_vm0 = vcmask 261120   ;;  %vm138_vm1 = vcmask 523264   ;;  %s463_s1 = inlined_call_operand.vmem [shape: f32[32,64], index: 1, kind: input, shape index: {}]   ;;  %s464_s0 = inlined_call_operand.vmem [shape: f32[16,32], index: 0, kind: input, shape index: {}]   ;;  %s465_s3 = inlined_call_operand.vmem [shape: f32[64,32], index: 3, kind: input, shape index: {}]   ;;  %s466_s2 = inlined_call_operand.vmem [shape: f32[1,64], index: 2, kind: input, shape index: {}]   ;;  %s467_s4 = inlined_call_operand.vmem [shape: f32[1,32], index: 4, kind: input, shape index: {}]   ;;  %s468_s5 = inlined_call_operand.vmem [shape: f32[1,32], index: 5, kind: input, shape index: {}]   ;;  %s469_s6 = inlined_call_operand.vmem [shape: f32[1,32], index: 6, kind: input, shape index: {}]   ;;  %s470_s7 = inlined_call_operand.vmem [shape: f32[16,32], index: 7, kind: output, shape index: {}]  }
   0x1   :  { %v28_v0 = vld [vmem:[%s463_s1] sm:$0xff]  ;;  %v29_v1 = vld [vmem:[%s463_s1 + $0x8] sm:$0xff]  ;;  %v30_v2 = vld [vmem:[%s463_s1 + $0x10] sm:$0xff] }
   0x2   :  { %v327_v3 = vpack.c.bf16 %v29_v1, %v28_v0  ;;  %v31_v4 = vld [vmem:[%s463_s1 + $0x18] sm:$0xff]  ;;  %v26_v5 = vld [vmem:[%s464_s0] sm:$0xff]  ;;  %v124_v8 = vld [vmem:[%s465_s3 + $0x8] sm:$0xff] }
   0x3   :  { %v331_v6 = vpack.c.bf16 %v31_v4, %v30_v2  ;;  %305 = vmatprep.mubr.msk.f32.mxu0 %vm39_vm0, %v26_v5  ;;  %v123_v7 = vld [vmem:[%s465_s3] sm:$0xff]  ;;  %v125_v9 = vld [vmem:[%s465_s3 + $0x10] sm:$0xff]  ;;  %v126_v11 = vld [vmem:[%s465_s3 + $0x18] sm:$0xff] }
   0x4   :  { %328 = vmatprep.subr.bf16.mxu0 %v327_v3  ;;  %v335_v10 = vpack.c.bf16 %v124_v8, %v123_v7  ;;  %v339_v12 = vpack.c.bf16 %v126_v11, %v125_v9  ;;  %v127_v13 = vld [vmem:[%s465_s3 + $0x20] sm:$0xff]  ;;  %v128_v14 = vld [vmem:[%s465_s3 + $0x28] sm:$0xff]  ;;  %v129_v17 = vld [vmem:[%s465_s3 + $0x30] sm:$0xff] }
   0x5   :  { %330 = vmatpush3.bf16.msra.mxu0 %v327_v3  ;;  %v343_v15 = vpack.c.bf16 %v128_v14, %v127_v13  ;;  %v27_v16 = vld [vmem:[%s464_s0 + $0x8] sm:$0xff]  ;;  %v130_v18 = vld [vmem:[%s465_s3 + $0x38] sm:$0xff]  ;;  %v273_v20 = vld [vmem:[%s466_s2] ss:$0 sm:$0xff] }
   0x6   :  { %332 = vmatprep.subr.bf16.mxu0 %v331_v6  ;;  %336 = vmatprep.subr.bf16.mxu1 %v335_v10  ;;  %v347_v19 = vpack.c.bf16 %v130_v18, %v129_v17  ;;  %v276_v27 = vld [vmem:[%s467_s4] ss:$0 sm:$0xff] }
   0x7   :  { %338 = vmatpush3.bf16.msra.mxu1 %v335_v10  ;;  %v279_v53 = vld [vmem:[%s468_s5] ss:$0 sm:$0xff] }
   0x8   :  { %340 = vmatprep.subr.bf16.mxu1 %v339_v12  ;;  %v280_v55 = vld [vmem:[%s469_s6] ss:$0 sm:$0xff] }
   0x9   :  { %334 = vmatpush3.bf16.msra.mxu0 %v331_v6 }
   0xb   :  { %342 = vmatpush3.bf16.msra.mxu1 %v339_v12 }
   0xc   :  { %306 = vmatmul.mubr.msk.f32.vlgmr.msra.gmra.mrb[0].mxu0 %vm39_vm0, %v27_v16  ;;  %344 = vmatprep.subr.bf16.mxu1 %v343_v15 }
   0xf   :  { %346 = vmatpush3.bf16.msra.mxu1 %v343_v15 }
  0x10   :  { %348 = vmatprep.subr.bf16.mxu1 %v347_v19 }
  0x13   :  { %350 = vmatpush3.bf16.msra.mxu1 %v347_v19 }
  0xdf   :  { %v307_v21 = vpop.f32.mrb[0].mxu0 }
  0xe0   :  { %v118_v22 = vadd.f32 %v307_v21, %v273_v20  ;;  %v112_v23 = vpop.f32.mrb[1].mxu0 }
  0xe1   :  { %v113_v24 = vadd.f32 %v273_v20, %v112_v23 }
  0xe2   :  { %v122_v26 = vmax.f32 %v118_v22, 0.0 }
  0xe3   :  { %v121_v25 = vmax.f32 %v113_v24, 0.0 }
  0xe5   :  { %324 = vmatprep.mubr.msk.f32.mxu1 %vm138_vm1, %v121_v25 }
  0xe6   :  { %325 = vmatmul.mubr.msk.f32.vlgmr.msra.gmra.mrb[0].mxu1 %vm138_vm1, %v122_v26 }
 0x1b9   :  { %v326_v28 = vpop.f32.mrb[0].mxu1 }
 0x1ba   :  { %v211_v29 = vpop.f32.mrb[1].mxu1  ;;  %v217_v30 = vadd.f32 %v326_v28, %v276_v27 }
 0x1bb   :  { %v212_v31 = vadd.f32 %v276_v27, %v211_v29 }
 0x1bc   :  { %v221_v34 = vadd.f32 %v217_v30, %v27_v16 }
 0x1bd   :  { %v220_v32 = vadd.f32 %v212_v31, %v26_v5 }
 0x1be   :  { %v225_v35 = vsel %vm39_vm0, %v221_v34, 0.0 }
 0x1bf   :  { %v222_v33 = vsel %vm39_vm0, %v220_v32, 0.0 }
 0x1c0   :  { %223 = vadd.xlane.f32.xlu0 %v222_v33 }
 0x1c4   :  { %226 = vadd.xlane.f32.xlu0 %v225_v35 }
 0x24d   :  { %v224_v36 = vpop.xlane.xlu0 %223 }
 0x24e   :  { %v229_v37 = vmul.f32 0.03125, %v224_v36 }
 0x250   :  { %v231_v38 = vsub.f32 %v220_v32, %v229_v37 }
 0x251   :  { %v227_v39 = vpop.xlane.xlu0 %226 }
 0x252   :  { %v230_v40 = vmul.f32 0.03125, %v227_v39  ;;  %v233_v41 = vmul.f32 %v231_v38, %v231_v38 }
 0x254   :  { %v232_v42 = vsub.f32 %v221_v34, %v230_v40  ;;  %v235_v43 = vsel %vm39_vm0, %v233_v41, 0.0 }
 0x255   :  { %236 = vadd.xlane.f32.xlu1 %v235_v43 }
 0x256   :  { %v234_v44 = vmul.f32 %v232_v42, %v232_v42 }
 0x258   :  { %v238_v45 = vsel %vm39_vm0, %v234_v44, 0.0 }
 0x259   :  { %239 = vadd.xlane.f32.xlu1 %v238_v45 }
 0x2e2   :  { %v237_v46 = vpop.xlane.xlu1 %236 }
 0x2e3   :  { %v241_v47 = vmul.f32 0.03125, %v237_v46 }
 0x2e5   :  { %v243_v48 = vadd.f32 1e-06, %v241_v47 }
 0x2e6   :  { %v240_v49 = vpop.xlane.xlu1 %239 }
 0x2e7   :  { %351 = vrsqrt.f32 %v243_v48  ;;  %v242_v50 = vmul.f32 0.03125, %v240_v49 }
 0x2e9   :  { %v244_v51 = vadd.f32 1e-06, %v242_v50 }
 0x2eb   :  { %353 = vrsqrt.f32 %v244_v51 }
 0x2f1   :  { %v352_v52 = vpop.eup %351 }
 0x2f2   :  { %v247_v54 = vmul.f32 %v352_v52, %v231_v38 }
 0x2f4   :  { %v256_v56 = vmul.f32 %v279_v53, %v247_v54 }
 0x2f5   :  { %v354_v57 = vpop.eup %353 }
 0x2f6   :  { %v265_v58 = vadd.f32 %v280_v55, %v256_v56  ;;  %v248_v59 = vmul.f32 %v354_v57, %v232_v42 }
 0x2f8   :  { %267 = vst.msk [vmem:[%s470_s7] sm:$0xff] %vm39_vm0, %v265_v58  ;;  %v257_v60 = vmul.f32 %v279_v53, %v248_v59 }
 0x2fa   :  { %v266_v61 = vadd.f32 %v280_v55, %v257_v60 }
 0x2fc   :  { %268 = vst.msk [vmem:[%s470_s7 + $0x8] sm:$0xff] %vm39_vm0, %v266_v61 }

// kernel: decoder_forward.33
= control target key start
LH: loop header
LB: loop body
LE: loop exit
PB: predicated region body
PF: predicated region fallthrough
CT: control target
= control target key end

     0   :  { %vm40_vm0 = vcmask 261120   ;;  %s512_s0 = inlined_call_operand.vmem [shape: f32[16,32], index: 0, kind: input, shape index: {}]   ;;  %s513_s1 = inlined_call_operand.vmem [shape: f32[32,64], index: 1, kind: input, shape index: {}]   ;;  %s514_s2 = inlined_call_operand.vmem [shape: f32[1,64], index: 2, kind: input, shape index: {}]   ;;  %s515_s3 = inlined_call_operand.vmem [shape: f32[64,32], index: 3, kind: input, shape index: {}]   ;;  %s516_s4 = inlined_call_operand.vmem [shape: f32[1,32], index: 4, kind: input, shape index: {}]   ;;  %s517_s5 = inlined_call_operand.vmem [shape: f32[1,32], index: 5, kind: input, shape index: {}]   ;;  %s518_s6 = inlined_call_operand.vmem [shape: f32[1,32], index: 6, kind: input, shape index: {}]   ;;  %s519_s7 = inlined_call_operand.hbm [shape: f32[16,32], index: 7, kind: output, shape index: {}]  }
   0x1   :  { %v29_v0 = vld [vmem:[%s513_s1] sm:$0xff]  ;;  %v30_v1 = vld [vmem:[%s513_s1 + $0x8] sm:$0xff]  ;;  %v31_v2 = vld [vmem:[%s513_s1 + $0x10] sm:$0xff] }
   0x2   :  { %v340_v3 = vpack.c.bf16 %v30_v1, %v29_v0  ;;  %v32_v4 = vld [vmem:[%s513_s1 + $0x18] sm:$0xff]  ;;  %v27_v5 = vld [vmem:[%s512_s0] sm:$0xff]  ;;  %v125_v8 = vld [vmem:[%s515_s3 + $0x8] sm:$0xff] }
   0x3   :  { %v344_v6 = vpack.c.bf16 %v32_v4, %v31_v2  ;;  %318 = vmatprep.mubr.msk.f32.mxu0 %vm40_vm0, %v27_v5  ;;  %v124_v7 = vld [vmem:[%s515_s3] sm:$0xff]  ;;  %v126_v9 = vld [vmem:[%s515_s3 + $0x10] sm:$0xff]  ;;  %v127_v11 = vld [vmem:[%s515_s3 + $0x18] sm:$0xff] }
   0x4   :  { %341 = vmatprep.subr.bf16.mxu0 %v340_v3  ;;  %v348_v10 = vpack.c.bf16 %v125_v8, %v124_v7  ;;  %v352_v12 = vpack.c.bf16 %v127_v11, %v126_v9  ;;  %v128_v13 = vld [vmem:[%s515_s3 + $0x20] sm:$0xff]  ;;  %v129_v14 = vld [vmem:[%s515_s3 + $0x28] sm:$0xff] }
   0x5   :  { %343 = vmatpush3.bf16.msra.mxu0 %v340_v3 }
   0x6   :  { %12 = vsyncpa [#allocation3], 0  ;;  %345 = vmatprep.subr.bf16.mxu0 %v344_v6  ;;  %349 = vmatprep.subr.bf16.mxu1 %v348_v10  ;;  %v356_v15 = vpack.c.bf16 %v129_v14, %v128_v13  ;;  %v28_v16 = vld [vmem:[%s512_s0 + $0x8] sm:$0xff]  ;;  %v130_v17 = vld [vmem:[%s515_s3 + $0x30] sm:$0xff]  ;;  %vm139_vm1 = vcmask 523264   ;;  %s395_s9 = smov [#allocation2]  }
   0x7   :  { %351 = vmatpush3.bf16.msra.mxu1 %v348_v10  ;;  %v131_v18 = vld [vmem:[%s515_s3 + $0x38] sm:$0xff]  ;;  %v286_v20 = vld [vmem:[%s514_s2] ss:$0 sm:$0xff]  ;;  %s275_s10 = sshll.u32 %s395_s9, 4  ;;  %s276_s10 = int_to_ptr.vmem [resolvable:$true] %s275_s10 }
   0x8   :  { %353 = vmatprep.subr.bf16.mxu1 %v352_v12  ;;  %v360_v19 = vpack.c.bf16 %v131_v18, %v130_v17  ;;  %v289_v27 = vld [vmem:[%s516_s4] ss:$0 sm:$0xff]  ;;  %s371_s11 = scalar_lea.vmem %s276_s10, 256  ;;  %p376_p1 = scmp.lt.s32.totalorder %s276_s10, %s276_s10 }
   0x9   :  { %347 = vmatpush3.bf16.msra.mxu0 %v344_v6  ;;  %v292_v53 = vld [vmem:[%s517_s5] ss:$0 sm:$0xff]  ;;  %p372_p0 = scmp.ne.s32.totalorder %s276_s10, %s371_s11  ;;  %p377_p2 = scmp.lt.s32.totalorder %s371_s11, %s371_s11 }
   0xa   :  { %v293_v55 = vld [vmem:[%s518_s6] ss:$0 sm:$0xff] }
   0xb   :  { %355 = vmatpush3.bf16.msra.mxu1 %v352_v12  ;;  %p378_p3 = por %p377_p2, %p376_p1 }
   0xc   :  { %319 = vmatmul.mubr.msk.f32.vlgmr.msra.gmra.mrb[0].mxu0 %vm40_vm0, %v28_v16  ;;  %357 = vmatprep.subr.bf16.mxu1 %v356_v15 }
   0xd   :  { %p379_p4 = pnand %p378_p3, %p372_p0 }
   0xf   :  { %359 = vmatpush3.bf16.msra.mxu1 %v356_v15 }
  0x10   :  { %361 = vmatprep.subr.bf16.mxu1 %v360_v19 }
  0x13   :  { %363 = vmatpush3.bf16.msra.mxu1 %v360_v19 }
  0xdf   :  { %v320_v21 = vpop.f32.mrb[0].mxu0 }
  0xe0   :  { %v119_v22 = vadd.f32 %v320_v21, %v286_v20  ;;  %v113_v23 = vpop.f32.mrb[1].mxu0 }
  0xe1   :  { %v114_v24 = vadd.f32 %v286_v20, %v113_v23 }
  0xe2   :  { %v123_v26 = vmax.f32 %v119_v22, 0.0 }
  0xe3   :  { %v122_v25 = vmax.f32 %v114_v24, 0.0 }
  0xe5   :  { %337 = vmatprep.mubr.msk.f32.mxu1 %vm139_vm1, %v122_v25 }
  0xe6   :  { %338 = vmatmul.mubr.msk.f32.vlgmr.msra.gmra.mrb[0].mxu1 %vm139_vm1, %v123_v26 }
 0x1b9   :  { %v339_v28 = vpop.f32.mrb[0].mxu1 }
 0x1ba   :  { %v212_v29 = vpop.f32.mrb[1].mxu1  ;;  %v218_v30 = vadd.f32 %v339_v28, %v289_v27 }
 0x1bb   :  { %v213_v31 = vadd.f32 %v289_v27, %v212_v29 }
 0x1bc   :  { %v222_v34 = vadd.f32 %v218_v30, %v28_v16 }
 0x1bd   :  { %v221_v32 = vadd.f32 %v213_v31, %v27_v5 }
 0x1be   :  { %v226_v35 = vsel %vm40_vm0, %v222_v34, 0.0 }
 0x1bf   :  { %v223_v33 = vsel %vm40_vm0, %v221_v32, 0.0 }
 0x1c0   :  { %224 = vadd.xlane.f32.xlu0 %v223_v33 }
 0x1c4   :  { %227 = vadd.xlane.f32.xlu0 %v226_v35 }
 0x24d   :  { %v225_v36 = vpop.xlane.xlu0 %224 }
 0x24e   :  { %v230_v37 = vmul.f32 0.03125, %v225_v36 }
 0x250   :  { %v232_v38 = vsub.f32 %v221_v32, %v230_v37 }
 0x251   :  { %v228_v39 = vpop.xlane.xlu0 %227 }
 0x252   :  { %v231_v40 = vmul.f32 0.03125, %v228_v39  ;;  %v234_v41 = vmul.f32 %v232_v38, %v232_v38 }
 0x254   :  { %v233_v42 = vsub.f32 %v222_v34, %v231_v40  ;;  %v236_v43 = vsel %vm40_vm0, %v234_v41, 0.0 }
 0x255   :  { %237 = vadd.xlane.f32.xlu1 %v236_v43 }
 0x256   :  { %v235_v44 = vmul.f32 %v233_v42, %v233_v42 }
 0x258   :  { %v239_v45 = vsel %vm40_vm0, %v235_v44, 0.0 }
 0x259   :  { %240 = vadd.xlane.f32.xlu1 %v239_v45 }
 0x2e2   :  { %v238_v46 = vpop.xlane.xlu1 %237 }
 0x2e3   :  { %v242_v47 = vmul.f32 0.03125, %v238_v46 }
 0x2e5   :  { %v244_v48 = vadd.f32 1e-06, %v242_v47 }
 0x2e6   :  { %v241_v49 = vpop.xlane.xlu1 %240 }
 0x2e7   :  { %367 = vrsqrt.f32 %v244_v48  ;;  %v243_v50 = vmul.f32 0.03125, %v241_v49 }
 0x2e9   :  { %v245_v51 = vadd.f32 1e-06, %v243_v50 }
 0x2eb   :  { %369 = vrsqrt.f32 %v245_v51 }
 0x2f1   :  { %v368_v52 = vpop.eup %367 }
 0x2f2   :  { %v248_v54 = vmul.f32 %v368_v52, %v232_v38 }
 0x2f4   :  { %v257_v56 = vmul.f32 %v292_v53, %v248_v54 }
 0x2f5   :  { %v370_v57 = vpop.eup %369 }
 0x2f6   :  { %v249_v58 = vmul.f32 %v370_v57, %v233_v42  ;;  %v266_v59 = vadd.f32 %v293_v55, %v257_v56 }
 0x2f8   :  { %v258_v60 = vmul.f32 %v292_v53, %v249_v58  ;;  %268 = vst.msk [vmem:[#allocation2] sm:$0xff] %vm40_vm0, %v266_v59 }
 0x2fa   :  { %v267_v61 = vadd.f32 %v293_v55, %v258_v60 }
 0x2fc   :  { %269 = vst.msk [vmem:[#allocation2 + $0x8] sm:$0xff] %vm40_vm0, %v267_v61 }
 0x2fd   :  { %382 = shalt.err (!%p379_p4)
}
 0x2fe   :  { %s383_s12 = scalar_lea.hbm %s519_s7, 256 }
 0x2ff   :  { %p384_p5 = scmp.ne.s32.totalorder %s519_s7, %s383_s12  ;;  %p387_p6 = scmp.lt.u32.totalorder %s383_s12, %s519_s7 }
 0x301   :  { %p389_p7 = pnand %p387_p6, %p384_p5 }
 0x303   :  { %392 = shalt.err (!%p389_p7)
}
 0x304   :  { %s396_s1 = smov 128   ;;  %s397_s17 = smov 8  }
 0x305   :  { %281 = dma.vmem_to_hbm [thread:$0]  %s276_s10, 256, %s519_s7, [#allocation3], %s396_s1, %s396_s1, %s397_s17  }
 0x306   :  { %393 = dma.done.wait [#allocation3], 256  }
 0x307   :  { %394 = vsyncadd [#allocation3], 4294967040 }
 0x308   :  { %285 = vsyncpa [#allocation3], 1 }

</bundles_post_ra>
